<compile_context>
chip_gen: v7x
topology: tpu7x:2x2x1
jax: 0.10.0
libtpu: 0.0.40
codegen_flags: <defaults>
</compile_context>

<pallas_src>
import functools

import jax
import jax.numpy as jnp
from jax.experimental import pallas as pl
from jax.experimental.pallas import tpu as pltpu

_LANE = 128


def _round_up(n, m):
    return ((n + m - 1) // m) * m


def net2_kernel(x_ref,
                w1_ref, b1_ref,
                w2_ref, b2_ref,
                w3_ref, b3_ref,
                w4_ref, b4_ref,
                w5_ref, b5_ref,
                out_ref,
                *, nsub):
    """One batch tile of the full Net2 forward, fused in VMEM.

    Feature-major: activations are [features, cols] with batch on the lane
    axis; weights are PyTorch-layout [out, in], so each layer is W @ X + b.
    """
    # Hoist every weight load once for the whole unrolled 15-layer chain.
    w1 = w1_ref[...]; w2 = w2_ref[...]; w3 = w3_ref[...]
    w4 = w4_ref[...]; w5 = w5_ref[...]

    cols = x_ref.shape[1]
    sub = cols // nsub                 # lane-columns per independent chain
    hid = w1.shape[0]
    out_dim = w5.shape[0]

    # Hoisted bias broadcasts (once per block, not once per matmul).
    b1 = jnp.broadcast_to(b1_ref[...], (hid, sub))
    b2 = jnp.broadcast_to(b2_ref[...], (hid, sub))
    b3 = jnp.broadcast_to(b3_ref[...], (hid, sub))
    b4 = jnp.broadcast_to(b4_ref[...], (hid, sub))
    b5 = jnp.broadcast_to(b5_ref[...], (out_dim, sub))

    def layer(vs, w, b, act=True, res=False):
        outs = []
        for v in vs:
            o = jnp.dot(w, v, preferred_element_type=jnp.float32) + b
            if res:
                o = o + v
            if act:
                o = jnp.maximum(o, 0.0)
            outs.append(o)
        return outs

    # nsub independent lane-column chains; each layer runs on all chains
    # before the next layer so their MXU pipelines overlap.
    xs = [x_ref[:, pl.ds(s * sub, sub)].astype(jnp.float32) for s in range(nsub)]

    xs = layer(xs, w1, b1)                   # fc1 + relu
    xs = layer(xs, w2, b2)                   # fc2 + relu
    xs = layer(xs, w3, b3, res=True)         # fc3(x) + x, relu
    xs = layer(xs, w4, b4)                   # fc4 + relu
    xs = layer(xs, w4, b4)                   # fc4 + relu
    xs = layer(xs, w4, b4, res=True)         # fc4(y) + y, relu
    xs = layer(xs, w4, b4)                   # fc4 + relu
    xs = layer(xs, w4, b4)                   # fc4 + relu
    xs = layer(xs, w4, b4, res=True)         # fc4(z) + z, relu
    xs = layer(xs, w4, b4)                   # fc4 + relu
    xs = layer(xs, w4, b4)                   # fc4 + relu
    xs = layer(xs, w4, b4)                   # fc4 + relu
    xs = layer(xs, w4, b4, res=True)         # fc4(m) + m, relu
    xs = layer(xs, w5, b5, act=False)        # fc5 (no relu), lane-dense store

    for s in range(nsub):
        out_ref[:, pl.ds(s * sub, sub)] = xs[s].astype(out_ref.dtype)


def net2_forward(x, params, *, block_cols=None, nsub=2, target_steps=2,
                 max_block_cols=2048):
    """x: [batch, input_dim] f32.

    params: PyTorch-layout weights W:[out, in] and biases b:[out, 1].
    nsub: independent MXU chains per block (4 on v5e, 2-3 on v6e/v7x).
    """
    batch, input_dim = x.shape
    hidden_dim = params["w1"].shape[0]
    output_dim = params["w5"].shape[0]

    # Feature-major: batch on the 128-lane axis (one cheap transpose each way).
    xt = x.T                                           # [input_dim, batch]

    # Grid: as few, fat steps as possible.  >=2 balanced 128-lane-aligned
    # steps only when the batch is big enough (v7x megacore); otherwise a
    # single un-padded step (no per-step overhead; best on v5e/v6e).
    if block_cols is None:
        if batch >= target_steps * _LANE:
            block_cols = _round_up(pl.cdiv(batch, target_steps), _LANE)
            block_cols = min(block_cols, max_block_cols)
        else:
            block_cols = batch
    if block_cols >= batch:
        block_cols = batch
        padded_batch = batch
    else:
        block_cols = _round_up(block_cols, _LANE)
        padded_batch = _round_up(batch, block_cols)
        if padded_batch != batch:
            # Ragged-tail fallback only; the defaults above avoid this pad.
            xt = jnp.pad(xt, ((0, 0), (0, padded_batch - batch)))
    grid = (padded_batch // block_cols,)

    # Each chain must stay 128-lane aligned; fall back toward a single chain.
    nsub = max(int(nsub), 1)
    while nsub > 1 and block_cols % (_LANE * nsub) != 0:
        nsub -= 1

    const = lambda a: pl.BlockSpec(a.shape, lambda i: (0, 0))   # VMEM-resident
    in_specs = [
        pl.BlockSpec((input_dim, block_cols), lambda i: (0, i)),  # x tile
        const(params["w1"]), const(params["b1"]),
        const(params["w2"]), const(params["b2"]),
        const(params["w3"]), const(params["b3"]),
        const(params["w4"]), const(params["b4"]),
        const(params["w5"]), const(params["b5"]),
    ]
    out_specs = pl.BlockSpec((output_dim, block_cols), lambda i: (0, i))

    # Advisory cost estimate so XLA can overlap this call with other work.
    flops = 2 * padded_batch * (
        input_dim * hidden_dim            # fc1
        + 12 * hidden_dim * hidden_dim    # fc2, fc3, 10x fc4
        + hidden_dim * output_dim)        # fc5
    bytes_accessed = 4 * (
        padded_batch * input_dim + padded_batch * output_dim
        + input_dim * hidden_dim + 3 * hidden_dim * hidden_dim
        + hidden_dim * output_dim + 4 * hidden_dim + output_dim)
    cost = pl.CostEstimate(flops=flops, transcendentals=0,
                           bytes_accessed=bytes_accessed)

    out_fm = pl.pallas_call(
        functools.partial(net2_kernel, nsub=nsub),
        out_shape=jax.ShapeDtypeStruct((output_dim, padded_batch), jnp.float32),
        grid=grid,
        in_specs=in_specs,
        out_specs=out_specs,
        compiler_params=pltpu.CompilerParams(
            dimension_semantics=("parallel",),      # megacore shard on v7x
            vmem_limit_bytes=32 * 1024 * 1024,      # headroom under v7x 64 MiB
        ),
        cost_estimate=cost,
    )(xt, params["w1"], params["b1"], params["w2"], params["b2"],
      params["w3"], params["b3"], params["w4"], params["b4"],
      params["w5"], params["b5"])

    return out_fm[:, :batch].T                       # back to [batch, out_dim]


def init_params(key, input_dim, hidden_dim, output_dim):
    """PyTorch Linear default init: W:[out,in], b:[out,1], U[-1/sqrt(fan_in), +]."""
    def linear(key, fan_in, fan_out):
        kw, kb = jax.random.split(key)
        bound = 1.0 / jnp.sqrt(jnp.float32(fan_in))
        w = jax.random.uniform(kw, (fan_out, fan_in), jnp.float32, -bound, bound)
        b = jax.random.uniform(kb, (fan_out, 1), jnp.float32, -bound, bound)
        return w, b

    k1, k2, k3, k4, k5 = jax.random.split(key, 5)
    w1, b1 = linear(k1, input_dim, hidden_dim)
    w2, b2 = linear(k2, hidden_dim, hidden_dim)
    w3, b3 = linear(k3, hidden_dim, hidden_dim)
    w4, b4 = linear(k4, hidden_dim, hidden_dim)
    w5, b5 = linear(k5, hidden_dim, output_dim)
    return dict(w1=w1, b1=b1, w2=w2, b2=b2, w3=w3, b3=b3,
                w4=w4, b4=b4, w5=w5, b5=b5)


def net2_reference(x, p):
    """Pure-JAX reference of the exact PyTorch forward graph (f32-accurate)."""
    relu = lambda v: jnp.maximum(v, 0.0)

    def lin(v, w, b):
        return jnp.dot(v, w.T, precision=jax.lax.Precision.HIGHEST) + b[:, 0]

    x = relu(lin(x, p["w1"], p["b1"]))
    x = relu(lin(x, p["w2"], p["b2"]))
    y = relu(lin(x, p["w3"], p["b3"]) + x)
    y = relu(lin(y, p["w4"], p["b4"]))
    y = relu(lin(y, p["w4"], p["b4"]))
    z = relu(lin(y, p["w4"], p["b4"]) + y)
    z = relu(lin(z, p["w4"], p["b4"]))
    z = relu(lin(z, p["w4"], p["b4"]))
    m = relu(lin(z, p["w4"], p["b4"]) + z)
    m = relu(lin(m, p["w4"], p["b4"]))
    m = relu(lin(m, p["w4"], p["b4"]))
    m = relu(lin(m, p["w4"], p["b4"]))
    n = relu(lin(m, p["w4"], p["b4"]) + m)
    return lin(n, p["w5"], p["b5"])


if __name__ == "__main__":
    input_dim, hidden_dim, output_dim = 16, 32, 8
    batch = 512   # -> grid=(2,) of 256-lane tiles (megacore), nsub=2 chains/tile

    key = jax.random.PRNGKey(0)
    kx, kp = jax.random.split(key)
    x = jax.random.normal(kx, (batch, input_dim), jnp.float32)
    params = init_params(kp, input_dim, hidden_dim, output_dim)

    out = net2_forward(x, params)
    jax.block_until_ready(out)

    ref = net2_reference(x, params)
    assert out.shape == (batch, output_dim)
    assert jnp.allclose(out, ref, atol=1e-4, rtol=1e-4)

    print("KERNEL_OK")
</pallas_src>

<mosaic_0001>
module attributes {stable_mosaic.version = 11 : i64} {
  func.func @net2_kernel(%arg0: i32, %arg1: memref<16x256xf32, #tpu.memory_space<vmem>>, %arg2: memref<32x16xf32, #tpu.memory_space<vmem>>, %arg3: memref<32x1xf32, #tpu.memory_space<vmem>>, %arg4: memref<32x32xf32, #tpu.memory_space<vmem>>, %arg5: memref<32x1xf32, #tpu.memory_space<vmem>>, %arg6: memref<32x32xf32, #tpu.memory_space<vmem>>, %arg7: memref<32x1xf32, #tpu.memory_space<vmem>>, %arg8: memref<32x32xf32, #tpu.memory_space<vmem>>, %arg9: memref<32x1xf32, #tpu.memory_space<vmem>>, %arg10: memref<8x32xf32, #tpu.memory_space<vmem>>, %arg11: memref<8x1xf32, #tpu.memory_space<vmem>>, %arg12: memref<8x256xf32, #tpu.memory_space<vmem>>) attributes {dimension_semantics = [#tpu.dimension_semantics<parallel>], iteration_bounds = array<i64: 2>, scalar_prefetch = 0 : i64, scratch_operands = 0 : i64, tpu.core_type = #tpu.core_type<tc>, window_params = [{transform_indices = @transform_0, window_bounds = array<i64: 16, 256>}, {pipeline_mode = #tpu.pipeline_mode<synchronous>, transform_indices = @transform_1, window_bounds = array<i64: 32, 16>}, {pipeline_mode = #tpu.pipeline_mode<synchronous>, transform_indices = @transform_2, window_bounds = array<i64: 32, 1>}, {pipeline_mode = #tpu.pipeline_mode<synchronous>, transform_indices = @transform_3, window_bounds = array<i64: 32, 32>}, {pipeline_mode = #tpu.pipeline_mode<synchronous>, transform_indices = @transform_4, window_bounds = array<i64: 32, 1>}, {pipeline_mode = #tpu.pipeline_mode<synchronous>, transform_indices = @transform_5, window_bounds = array<i64: 32, 32>}, {pipeline_mode = #tpu.pipeline_mode<synchronous>, transform_indices = @transform_6, window_bounds = array<i64: 32, 1>}, {pipeline_mode = #tpu.pipeline_mode<synchronous>, transform_indices = @transform_7, window_bounds = array<i64: 32, 32>}, {pipeline_mode = #tpu.pipeline_mode<synchronous>, transform_indices = @transform_8, window_bounds = array<i64: 32, 1>}, {pipeline_mode = #tpu.pipeline_mode<synchronous>, transform_indices = @transform_9, window_bounds = array<i64: 8, 32>}, {pipeline_mode = #tpu.pipeline_mode<synchronous>, transform_indices = @transform_10, window_bounds = array<i64: 8, 1>}, {transform_indices = @transform_11, window_bounds = array<i64: 8, 256>}]} {
    %c0 = arith.constant 0 : index
    %c0_0 = arith.constant 0 : index
    %0 = vector.load %arg2[%c0, %c0_0] : memref<32x16xf32, #tpu.memory_space<vmem>>, vector<32x16xf32>
    %c0_1 = arith.constant 0 : index
    %c0_2 = arith.constant 0 : index
    %1 = vector.load %arg4[%c0_1, %c0_2] : memref<32x32xf32, #tpu.memory_space<vmem>>, vector<32x32xf32>
    %c0_3 = arith.constant 0 : index
    %c0_4 = arith.constant 0 : index
    %2 = vector.load %arg6[%c0_3, %c0_4] : memref<32x32xf32, #tpu.memory_space<vmem>>, vector<32x32xf32>
    %c0_5 = arith.constant 0 : index
    %c0_6 = arith.constant 0 : index
    %3 = vector.load %arg8[%c0_5, %c0_6] : memref<32x32xf32, #tpu.memory_space<vmem>>, vector<32x32xf32>
    %c0_7 = arith.constant 0 : index
    %c0_8 = arith.constant 0 : index
    %4 = vector.load %arg10[%c0_7, %c0_8] : memref<8x32xf32, #tpu.memory_space<vmem>>, vector<8x32xf32>
    %c0_9 = arith.constant 0 : index
    %c0_10 = arith.constant 0 : index
    %5 = vector.load %arg3[%c0_9, %c0_10] : memref<32x1xf32, #tpu.memory_space<vmem>>, vector<32x1xf32>
    %6 = vector.shape_cast %5 : vector<32x1xf32> to vector<32x1xf32>
    %7 = vector.broadcast %6 : vector<32x1xf32> to vector<32x128xf32>
    %c0_11 = arith.constant 0 : index
    %c0_12 = arith.constant 0 : index
    %8 = vector.load %arg5[%c0_11, %c0_12] : memref<32x1xf32, #tpu.memory_space<vmem>>, vector<32x1xf32>
    %9 = vector.shape_cast %8 : vector<32x1xf32> to vector<32x1xf32>
    %10 = vector.broadcast %9 : vector<32x1xf32> to vector<32x128xf32>
    %c0_13 = arith.constant 0 : index
    %c0_14 = arith.constant 0 : index
    %11 = vector.load %arg7[%c0_13, %c0_14] : memref<32x1xf32, #tpu.memory_space<vmem>>, vector<32x1xf32>
    %12 = vector.shape_cast %11 : vector<32x1xf32> to vector<32x1xf32>
    %13 = vector.broadcast %12 : vector<32x1xf32> to vector<32x128xf32>
    %c0_15 = arith.constant 0 : index
    %c0_16 = arith.constant 0 : index
    %14 = vector.load %arg9[%c0_15, %c0_16] : memref<32x1xf32, #tpu.memory_space<vmem>>, vector<32x1xf32>
    %15 = vector.shape_cast %14 : vector<32x1xf32> to vector<32x1xf32>
    %16 = vector.broadcast %15 : vector<32x1xf32> to vector<32x128xf32>
    %c0_17 = arith.constant 0 : index
    %c0_18 = arith.constant 0 : index
    %17 = vector.load %arg11[%c0_17, %c0_18] : memref<8x1xf32, #tpu.memory_space<vmem>>, vector<8x1xf32>
    %18 = vector.shape_cast %17 : vector<8x1xf32> to vector<8x1xf32>
    %19 = vector.broadcast %18 : vector<8x1xf32> to vector<8x128xf32>
    %c0_19 = arith.constant 0 : index
    %c0_20 = arith.constant 0 : index
    %20 = vector.load %arg1[%c0_19, %c0_20] : memref<16x256xf32, #tpu.memory_space<vmem>>, vector<16x128xf32>
    %c0_21 = arith.constant 0 : index
    %c128 = arith.constant 128 : index
    %21 = vector.load %arg1[%c0_21, %c128] : memref<16x256xf32, #tpu.memory_space<vmem>>, vector<16x128xf32>
    %cst = arith.constant dense<0.000000e+00> : vector<32x128xf32>
    %22 = tpu.matmul %0, %20, %cst {dimension_numbers = #tpu.dot_dimension_numbers<[1], [0], [0], [1], [0, 0, 1, 1], [], []>} : vector<32x16xf32>, vector<16x128xf32>, vector<32x128xf32> -> vector<32x128xf32>
    %23 = arith.addf %22, %7 : vector<32x128xf32>
    %cst_22 = arith.constant 0.000000e+00 : f32
    %24 = vector.broadcast %cst_22 : f32 to vector<32x128xf32>
    %25 = arith.maximumf %23, %24 : vector<32x128xf32>
    %cst_23 = arith.constant dense<0.000000e+00> : vector<32x128xf32>
    %26 = tpu.matmul %0, %21, %cst_23 {dimension_numbers = #tpu.dot_dimension_numbers<[1], [0], [0], [1], [0, 0, 1, 1], [], []>} : vector<32x16xf32>, vector<16x128xf32>, vector<32x128xf32> -> vector<32x128xf32>
    %27 = arith.addf %26, %7 : vector<32x128xf32>
    %cst_24 = arith.constant 0.000000e+00 : f32
    %28 = vector.broadcast %cst_24 : f32 to vector<32x128xf32>
    %29 = arith.maximumf %27, %28 : vector<32x128xf32>
    %cst_25 = arith.constant dense<0.000000e+00> : vector<32x128xf32>
    %30 = tpu.matmul %1, %25, %cst_25 {dimension_numbers = #tpu.dot_dimension_numbers<[1], [0], [0], [1], [0, 0, 1, 1], [], []>} : vector<32x32xf32>, vector<32x128xf32>, vector<32x128xf32> -> vector<32x128xf32>
    %31 = arith.addf %30, %10 : vector<32x128xf32>
    %cst_26 = arith.constant 0.000000e+00 : f32
    %32 = vector.broadcast %cst_26 : f32 to vector<32x128xf32>
    %33 = arith.maximumf %31, %32 : vector<32x128xf32>
    %cst_27 = arith.constant dense<0.000000e+00> : vector<32x128xf32>
    %34 = tpu.matmul %1, %29, %cst_27 {dimension_numbers = #tpu.dot_dimension_numbers<[1], [0], [0], [1], [0, 0, 1, 1], [], []>} : vector<32x32xf32>, vector<32x128xf32>, vector<32x128xf32> -> vector<32x128xf32>
    %35 = arith.addf %34, %10 : vector<32x128xf32>
    %cst_28 = arith.constant 0.000000e+00 : f32
    %36 = vector.broadcast %cst_28 : f32 to vector<32x128xf32>
    %37 = arith.maximumf %35, %36 : vector<32x128xf32>
    %cst_29 = arith.constant dense<0.000000e+00> : vector<32x128xf32>
    %38 = tpu.matmul %2, %33, %cst_29 {dimension_numbers = #tpu.dot_dimension_numbers<[1], [0], [0], [1], [0, 0, 1, 1], [], []>} : vector<32x32xf32>, vector<32x128xf32>, vector<32x128xf32> -> vector<32x128xf32>
    %39 = arith.addf %38, %13 : vector<32x128xf32>
    %40 = arith.addf %39, %33 : vector<32x128xf32>
    %cst_30 = arith.constant 0.000000e+00 : f32
    %41 = vector.broadcast %cst_30 : f32 to vector<32x128xf32>
    %42 = arith.maximumf %40, %41 : vector<32x128xf32>
    %cst_31 = arith.constant dense<0.000000e+00> : vector<32x128xf32>
    %43 = tpu.matmul %2, %37, %cst_31 {dimension_numbers = #tpu.dot_dimension_numbers<[1], [0], [0], [1], [0, 0, 1, 1], [], []>} : vector<32x32xf32>, vector<32x128xf32>, vector<32x128xf32> -> vector<32x128xf32>
    %44 = arith.addf %43, %13 : vector<32x128xf32>
    %45 = arith.addf %44, %37 : vector<32x128xf32>
    %cst_32 = arith.constant 0.000000e+00 : f32
    %46 = vector.broadcast %cst_32 : f32 to vector<32x128xf32>
    %47 = arith.maximumf %45, %46 : vector<32x128xf32>
    %cst_33 = arith.constant dense<0.000000e+00> : vector<32x128xf32>
    %48 = tpu.matmul %3, %42, %cst_33 {dimension_numbers = #tpu.dot_dimension_numbers<[1], [0], [0], [1], [0, 0, 1, 1], [], []>} : vector<32x32xf32>, vector<32x128xf32>, vector<32x128xf32> -> vector<32x128xf32>
    %49 = arith.addf %48, %16 : vector<32x128xf32>
    %cst_34 = arith.constant 0.000000e+00 : f32
    %50 = vector.broadcast %cst_34 : f32 to vector<32x128xf32>
    %51 = arith.maximumf %49, %50 : vector<32x128xf32>
    %cst_35 = arith.constant dense<0.000000e+00> : vector<32x128xf32>
    %52 = tpu.matmul %3, %47, %cst_35 {dimension_numbers = #tpu.dot_dimension_numbers<[1], [0], [0], [1], [0, 0, 1, 1], [], []>} : vector<32x32xf32>, vector<32x128xf32>, vector<32x128xf32> -> vector<32x128xf32>
    %53 = arith.addf %52, %16 : vector<32x128xf32>
    %cst_36 = arith.constant 0.000000e+00 : f32
    %54 = vector.broadcast %cst_36 : f32 to vector<32x128xf32>
    %55 = arith.maximumf %53, %54 : vector<32x128xf32>
    %cst_37 = arith.constant dense<0.000000e+00> : vector<32x128xf32>
    %56 = tpu.matmul %3, %51, %cst_37 {dimension_numbers = #tpu.dot_dimension_numbers<[1], [0], [0], [1], [0, 0, 1, 1], [], []>} : vector<32x32xf32>, vector<32x128xf32>, vector<32x128xf32> -> vector<32x128xf32>
    %57 = arith.addf %56, %16 : vector<32x128xf32>
    %cst_38 = arith.constant 0.000000e+00 : f32
    %58 = vector.broadcast %cst_38 : f32 to vector<32x128xf32>
    %59 = arith.maximumf %57, %58 : vector<32x128xf32>
    %cst_39 = arith.constant dense<0.000000e+00> : vector<32x128xf32>
    %60 = tpu.matmul %3, %55, %cst_39 {dimension_numbers = #tpu.dot_dimension_numbers<[1], [0], [0], [1], [0, 0, 1, 1], [], []>} : vector<32x32xf32>, vector<32x128xf32>, vector<32x128xf32> -> vector<32x128xf32>
    %61 = arith.addf %60, %16 : vector<32x128xf32>
    %cst_40 = arith.constant 0.000000e+00 : f32
    %62 = vector.broadcast %cst_40 : f32 to vector<32x128xf32>
    %63 = arith.maximumf %61, %62 : vector<32x128xf32>
    %cst_41 = arith.constant dense<0.000000e+00> : vector<32x128xf32>
    %64 = tpu.matmul %3, %59, %cst_41 {dimension_numbers = #tpu.dot_dimension_numbers<[1], [0], [0], [1], [0, 0, 1, 1], [], []>} : vector<32x32xf32>, vector<32x128xf32>, vector<32x128xf32> -> vector<32x128xf32>
    %65 = arith.addf %64, %16 : vector<32x128xf32>
    %66 = arith.addf %65, %59 : vector<32x128xf32>
    %cst_42 = arith.constant 0.000000e+00 : f32
    %67 = vector.broadcast %cst_42 : f32 to vector<32x128xf32>
    %68 = arith.maximumf %66, %67 : vector<32x128xf32>
    %cst_43 = arith.constant dense<0.000000e+00> : vector<32x128xf32>
    %69 = tpu.matmul %3, %63, %cst_43 {dimension_numbers = #tpu.dot_dimension_numbers<[1], [0], [0], [1], [0, 0, 1, 1], [], []>} : vector<32x32xf32>, vector<32x128xf32>, vector<32x128xf32> -> vector<32x128xf32>
    %70 = arith.addf %69, %16 : vector<32x128xf32>
    %71 = arith.addf %70, %63 : vector<32x128xf32>
    %cst_44 = arith.constant 0.000000e+00 : f32
    %72 = vector.broadcast %cst_44 : f32 to vector<32x128xf32>
    %73 = arith.maximumf %71, %72 : vector<32x128xf32>
    %cst_45 = arith.constant dense<0.000000e+00> : vector<32x128xf32>
    %74 = tpu.matmul %3, %68, %cst_45 {dimension_numbers = #tpu.dot_dimension_numbers<[1], [0], [0], [1], [0, 0, 1, 1], [], []>} : vector<32x32xf32>, vector<32x128xf32>, vector<32x128xf32> -> vector<32x128xf32>
    %75 = arith.addf %74, %16 : vector<32x128xf32>
    %cst_46 = arith.constant 0.000000e+00 : f32
    %76 = vector.broadcast %cst_46 : f32 to vector<32x128xf32>
    %77 = arith.maximumf %75, %76 : vector<32x128xf32>
    %cst_47 = arith.constant dense<0.000000e+00> : vector<32x128xf32>
    %78 = tpu.matmul %3, %73, %cst_47 {dimension_numbers = #tpu.dot_dimension_numbers<[1], [0], [0], [1], [0, 0, 1, 1], [], []>} : vector<32x32xf32>, vector<32x128xf32>, vector<32x128xf32> -> vector<32x128xf32>
    %79 = arith.addf %78, %16 : vector<32x128xf32>
    %cst_48 = arith.constant 0.000000e+00 : f32
    %80 = vector.broadcast %cst_48 : f32 to vector<32x128xf32>
    %81 = arith.maximumf %79, %80 : vector<32x128xf32>
    %cst_49 = arith.constant dense<0.000000e+00> : vector<32x128xf32>
    %82 = tpu.matmul %3, %77, %cst_49 {dimension_numbers = #tpu.dot_dimension_numbers<[1], [0], [0], [1], [0, 0, 1, 1], [], []>} : vector<32x32xf32>, vector<32x128xf32>, vector<32x128xf32> -> vector<32x128xf32>
    %83 = arith.addf %82, %16 : vector<32x128xf32>
    %cst_50 = arith.constant 0.000000e+00 : f32
    %84 = vector.broadcast %cst_50 : f32 to vector<32x128xf32>
    %85 = arith.maximumf %83, %84 : vector<32x128xf32>
    %cst_51 = arith.constant dense<0.000000e+00> : vector<32x128xf32>
    %86 = tpu.matmul %3, %81, %cst_51 {dimension_numbers = #tpu.dot_dimension_numbers<[1], [0], [0], [1], [0, 0, 1, 1], [], []>} : vector<32x32xf32>, vector<32x128xf32>, vector<32x128xf32> -> vector<32x128xf32>
    %87 = arith.addf %86, %16 : vector<32x128xf32>
    %cst_52 = arith.constant 0.000000e+00 : f32
    %88 = vector.broadcast %cst_52 : f32 to vector<32x128xf32>
    %89 = arith.maximumf %87, %88 : vector<32x128xf32>
    %cst_53 = arith.constant dense<0.000000e+00> : vector<32x128xf32>
    %90 = tpu.matmul %3, %85, %cst_53 {dimension_numbers = #tpu.dot_dimension_numbers<[1], [0], [0], [1], [0, 0, 1, 1], [], []>} : vector<32x32xf32>, vector<32x128xf32>, vector<32x128xf32> -> vector<32x128xf32>
    %91 = arith.addf %90, %16 : vector<32x128xf32>
    %92 = arith.addf %91, %85 : vector<32x128xf32>
    %cst_54 = arith.constant 0.000000e+00 : f32
    %93 = vector.broadcast %cst_54 : f32 to vector<32x128xf32>
    %94 = arith.maximumf %92, %93 : vector<32x128xf32>
    %cst_55 = arith.constant dense<0.000000e+00> : vector<32x128xf32>
    %95 = tpu.matmul %3, %89, %cst_55 {dimension_numbers = #tpu.dot_dimension_numbers<[1], [0], [0], [1], [0, 0, 1, 1], [], []>} : vector<32x32xf32>, vector<32x128xf32>, vector<32x128xf32> -> vector<32x128xf32>
    %96 = arith.addf %95, %16 : vector<32x128xf32>
    %97 = arith.addf %96, %89 : vector<32x128xf32>
    %cst_56 = arith.constant 0.000000e+00 : f32
    %98 = vector.broadcast %cst_56 : f32 to vector<32x128xf32>
    %99 = arith.maximumf %97, %98 : vector<32x128xf32>
    %cst_57 = arith.constant dense<0.000000e+00> : vector<32x128xf32>
    %100 = tpu.matmul %3, %94, %cst_57 {dimension_numbers = #tpu.dot_dimension_numbers<[1], [0], [0], [1], [0, 0, 1, 1], [], []>} : vector<32x32xf32>, vector<32x128xf32>, vector<32x128xf32> -> vector<32x128xf32>
    %101 = arith.addf %100, %16 : vector<32x128xf32>
    %cst_58 = arith.constant 0.000000e+00 : f32
    %102 = vector.broadcast %cst_58 : f32 to vector<32x128xf32>
    %103 = arith.maximumf %101, %102 : vector<32x128xf32>
    %cst_59 = arith.constant dense<0.000000e+00> : vector<32x128xf32>
    %104 = tpu.matmul %3, %99, %cst_59 {dimension_numbers = #tpu.dot_dimension_numbers<[1], [0], [0], [1], [0, 0, 1, 1], [], []>} : vector<32x32xf32>, vector<32x128xf32>, vector<32x128xf32> -> vector<32x128xf32>
    %105 = arith.addf %104, %16 : vector<32x128xf32>
    %cst_60 = arith.constant 0.000000e+00 : f32
    %106 = vector.broadcast %cst_60 : f32 to vector<32x128xf32>
    %107 = arith.maximumf %105, %106 : vector<32x128xf32>
    %cst_61 = arith.constant dense<0.000000e+00> : vector<32x128xf32>
    %108 = tpu.matmul %3, %103, %cst_61 {dimension_numbers = #tpu.dot_dimension_numbers<[1], [0], [0], [1], [0, 0, 1, 1], [], []>} : vector<32x32xf32>, vector<32x128xf32>, vector<32x128xf32> -> vector<32x128xf32>
    %109 = arith.addf %108, %16 : vector<32x128xf32>
    %cst_62 = arith.constant 0.000000e+00 : f32
    %110 = vector.broadcast %cst_62 : f32 to vector<32x128xf32>
    %111 = arith.maximumf %109, %110 : vector<32x128xf32>
    %cst_63 = arith.constant dense<0.000000e+00> : vector<32x128xf32>
    %112 = tpu.matmul %3, %107, %cst_63 {dimension_numbers = #tpu.dot_dimension_numbers<[1], [0], [0], [1], [0, 0, 1, 1], [], []>} : vector<32x32xf32>, vector<32x128xf32>, vector<32x128xf32> -> vector<32x128xf32>
    %113 = arith.addf %112, %16 : vector<32x128xf32>
    %cst_64 = arith.constant 0.000000e+00 : f32
    %114 = vector.broadcast %cst_64 : f32 to vector<32x128xf32>
    %115 = arith.maximumf %113, %114 : vector<32x128xf32>
    %cst_65 = arith.constant dense<0.000000e+00> : vector<32x128xf32>
    %116 = tpu.matmul %3, %111, %cst_65 {dimension_numbers = #tpu.dot_dimension_numbers<[1], [0], [0], [1], [0, 0, 1, 1], [], []>} : vector<32x32xf32>, vector<32x128xf32>, vector<32x128xf32> -> vector<32x128xf32>
    %117 = arith.addf %116, %16 : vector<32x128xf32>
    %cst_66 = arith.constant 0.000000e+00 : f32
    %118 = vector.broadcast %cst_66 : f32 to vector<32x128xf32>
    %119 = arith.maximumf %117, %118 : vector<32x128xf32>
    %cst_67 = arith.constant dense<0.000000e+00> : vector<32x128xf32>
    %120 = tpu.matmul %3, %115, %cst_67 {dimension_numbers = #tpu.dot_dimension_numbers<[1], [0], [0], [1], [0, 0, 1, 1], [], []>} : vector<32x32xf32>, vector<32x128xf32>, vector<32x128xf32> -> vector<32x128xf32>
    %121 = arith.addf %120, %16 : vector<32x128xf32>
    %cst_68 = arith.constant 0.000000e+00 : f32
    %122 = vector.broadcast %cst_68 : f32 to vector<32x128xf32>
    %123 = arith.maximumf %121, %122 : vector<32x128xf32>
    %cst_69 = arith.constant dense<0.000000e+00> : vector<32x128xf32>
    %124 = tpu.matmul %3, %119, %cst_69 {dimension_numbers = #tpu.dot_dimension_numbers<[1], [0], [0], [1], [0, 0, 1, 1], [], []>} : vector<32x32xf32>, vector<32x128xf32>, vector<32x128xf32> -> vector<32x128xf32>
    %125 = arith.addf %124, %16 : vector<32x128xf32>
    %126 = arith.addf %125, %119 : vector<32x128xf32>
    %cst_70 = arith.constant 0.000000e+00 : f32
    %127 = vector.broadcast %cst_70 : f32 to vector<32x128xf32>
    %128 = arith.maximumf %126, %127 : vector<32x128xf32>
    %cst_71 = arith.constant dense<0.000000e+00> : vector<32x128xf32>
    %129 = tpu.matmul %3, %123, %cst_71 {dimension_numbers = #tpu.dot_dimension_numbers<[1], [0], [0], [1], [0, 0, 1, 1], [], []>} : vector<32x32xf32>, vector<32x128xf32>, vector<32x128xf32> -> vector<32x128xf32>
    %130 = arith.addf %129, %16 : vector<32x128xf32>
    %131 = arith.addf %130, %123 : vector<32x128xf32>
    %cst_72 = arith.constant 0.000000e+00 : f32
    %132 = vector.broadcast %cst_72 : f32 to vector<32x128xf32>
    %133 = arith.maximumf %131, %132 : vector<32x128xf32>
    %cst_73 = arith.constant dense<0.000000e+00> : vector<8x128xf32>
    %134 = tpu.matmul %4, %128, %cst_73 {dimension_numbers = #tpu.dot_dimension_numbers<[1], [0], [0], [1], [0, 0, 1, 1], [], []>} : vector<8x32xf32>, vector<32x128xf32>, vector<8x128xf32> -> vector<8x128xf32>
    %135 = arith.addf %134, %19 : vector<8x128xf32>
    %cst_74 = arith.constant dense<0.000000e+00> : vector<8x128xf32>
    %136 = tpu.matmul %4, %133, %cst_74 {dimension_numbers = #tpu.dot_dimension_numbers<[1], [0], [0], [1], [0, 0, 1, 1], [], []>} : vector<8x32xf32>, vector<32x128xf32>, vector<8x128xf32> -> vector<8x128xf32>
    %137 = arith.addf %136, %19 : vector<8x128xf32>
    %c0_75 = arith.constant 0 : index
    %c0_76 = arith.constant 0 : index
    %138 = vector.load %arg12[%c0_75, %c0_76] : memref<8x256xf32, #tpu.memory_space<vmem>>, vector<8x128xf32>
    tpu.vector_store %arg12[%c0_75, %c0_76], %135 {strides = array<i32>} : memref<8x256xf32, #tpu.memory_space<vmem>>, vector<8x128xf32>,
    %c0_77 = arith.constant 0 : index
    %c128_78 = arith.constant 128 : index
    %139 = vector.load %arg12[%c0_77, %c128_78] : memref<8x256xf32, #tpu.memory_space<vmem>>, vector<8x128xf32>
    tpu.vector_store %arg12[%c0_77, %c128_78], %137 {strides = array<i32>} : memref<8x256xf32, #tpu.memory_space<vmem>>, vector<8x128xf32>,
    return
  }
  func.func @transform_0(%arg0: i32) -> (i32, i32) {
    %c0_i32 = arith.constant 0 : i32
    %c0_i32_0 = arith.constant 0 : i32
    return %c0_i32, %arg0 : i32, i32
  }
  func.func @transform_1(%arg0: i32) -> (i32, i32) {
    %c0_i32 = arith.constant 0 : i32
    %c0_i32_0 = arith.constant 0 : i32
    %c0_i32_1 = arith.constant 0 : i32
    return %c0_i32, %c0_i32_0 : i32, i32
  }
  func.func @transform_2(%arg0: i32) -> (i32, i32) {
    %c0_i32 = arith.constant 0 : i32
    %c0_i32_0 = arith.constant 0 : i32
    %c0_i32_1 = arith.constant 0 : i32
    return %c0_i32, %c0_i32_0 : i32, i32
  }
  func.func @transform_3(%arg0: i32) -> (i32, i32) {
    %c0_i32 = arith.constant 0 : i32
    %c0_i32_0 = arith.constant 0 : i32
    %c0_i32_1 = arith.constant 0 : i32
    return %c0_i32, %c0_i32_0 : i32, i32
  }
  func.func @transform_4(%arg0: i32) -> (i32, i32) {
    %c0_i32 = arith.constant 0 : i32
    %c0_i32_0 = arith.constant 0 : i32
    %c0_i32_1 = arith.constant 0 : i32
    return %c0_i32, %c0_i32_0 : i32, i32
  }
  func.func @transform_5(%arg0: i32) -> (i32, i32) {
    %c0_i32 = arith.constant 0 : i32
    %c0_i32_0 = arith.constant 0 : i32
    %c0_i32_1 = arith.constant 0 : i32
    return %c0_i32, %c0_i32_0 : i32, i32
  }
  func.func @transform_6(%arg0: i32) -> (i32, i32) {
    %c0_i32 = arith.constant 0 : i32
    %c0_i32_0 = arith.constant 0 : i32
    %c0_i32_1 = arith.constant 0 : i32
    return %c0_i32, %c0_i32_0 : i32, i32
  }
  func.func @transform_7(%arg0: i32) -> (i32, i32) {
    %c0_i32 = arith.constant 0 : i32
    %c0_i32_0 = arith.constant 0 : i32
    %c0_i32_1 = arith.constant 0 : i32
    return %c0_i32, %c0_i32_0 : i32, i32
  }
  func.func @transform_8(%arg0: i32) -> (i32, i32) {
    %c0_i32 = arith.constant 0 : i32
    %c0_i32_0 = arith.constant 0 : i32
    %c0_i32_1 = arith.constant 0 : i32
    return %c0_i32, %c0_i32_0 : i32, i32
  }
  func.func @transform_9(%arg0: i32) -> (i32, i32) {
    %c0_i32 = arith.constant 0 : i32
    %c0_i32_0 = arith.constant 0 : i32
    %c0_i32_1 = arith.constant 0 : i32
    return %c0_i32, %c0_i32_0 : i32, i32
  }
  func.func @transform_10(%arg0: i32) -> (i32, i32) {
    %c0_i32 = arith.constant 0 : i32
    %c0_i32_0 = arith.constant 0 : i32
    %c0_i32_1 = arith.constant 0 : i32
    return %c0_i32, %c0_i32_0 : i32, i32
  }
  func.func @transform_11(%arg0: i32) -> (i32, i32) {
    %c0_i32 = arith.constant 0 : i32
    %c0_i32_0 = arith.constant 0 : i32
    return %c0_i32, %arg0 : i32, i32
  }
}

</mosaic_0001>

<bundles_post_ra>
// kernel: tpu_custom_call.1
= control target key start
LH: loop header
LB: loop body
LE: loop exit
PB: predicated region body
PF: predicated region fallthrough
CT: control target
= control target key end

     0   :  { %s4754_s0 = inlined_call_operand.vmem [shape: f32[16,512], index: 0, kind: input, shape index: {}]   ;;  %s4755_s1 = inlined_call_operand.vmem [shape: f32[32,16], index: 1, kind: input, shape index: {}]   ;;  %s4756_s2 = inlined_call_operand.vmem [shape: f32[32,1], index: 2, kind: input, shape index: {}]   ;;  %s4757_s3 = inlined_call_operand.vmem [shape: f32[32,32], index: 3, kind: input, shape index: {}]   ;;  %s4758_s4 = inlined_call_operand.vmem [shape: f32[32,1], index: 4, kind: input, shape index: {}]   ;;  %s4759_s5 = inlined_call_operand.vmem [shape: f32[32,32], index: 5, kind: input, shape index: {}]   ;;  %s4760_s6 = inlined_call_operand.vmem [shape: f32[32,1], index: 6, kind: input, shape index: {}]   ;;  %s4761_s7 = inlined_call_operand.vmem [shape: f32[32,32], index: 7, kind: input, shape index: {}]   ;;  %s4762_s8 = inlined_call_operand.vmem [shape: f32[32,1], index: 8, kind: input, shape index: {}]   ;;  %s4763_s9 = inlined_call_operand.vmem [shape: f32[8,32], index: 9, kind: input, shape index: {}]   ;;  %s4764_s10 = inlined_call_operand.vmem [shape: f32[8,1], index: 10, kind: input, shape index: {}]   ;;  %s4765_s11 = inlined_call_operand.hbm [shape: f32[8,512], index: 11, kind: output, shape index: {}]  }
   0x1   :  { %4767 = sst [smem:[#allocation6_spill]] %s4754_s0 }
   0x2   :  { %16 = vsyncpa [#allocation4], 0 }
   0x3   :  { %18 = vsyncpa [#allocation4 + $0x1], 0  ;;  %s4257_s17 = smov 0   ;;  %s4259_s18 = smov 0  }
   0x4   :  { %s4261_s19 = smov 0   ;;  %s4263_s20 = smov 0  }
   0x5 LB: > { %s4766_s21 = sadd.s32 4294967295, %s4190_s20   ;;  %s3157_s22 = sadd.s32 4294967294, %s4190_s20   ;;  %s4190_s20 = sphi %s4263_s20, %s4775_s20   ;;  %s4186_s19 = sphi %s4261_s19, %s4774_s19   ;;  %s4182_s18 = sphi %s4259_s18, %s4773_s18   ;;  %s4178_s17 = sphi %s4257_s17, %s4772_s17  }
   0x6   : > { %s4280_s23 = sadd.s32 1, %s4190_s20   ;;  %s31_s24 = sadd.s32 1, %s4186_s19 }
   0x7   : > { %s28_s25 = ssub.s32 %s4190_s20, %s4280_s23  ;;  %p38_p0 = scmp.ne.s32.totalorder %s4186_s19, %s4182_s18 }
   0x8   : > { %p29_p1 = scmp.eq.s32.totalorder %s28_s25, 0  ;;  %p39_p2 = scmp.eq.s32.totalorder %s4190_s20, 0 }
   0x9   : > { %p278_p3 = scmp.eq.s32.totalorder %s4766_s21, 1  ;;  %p283_p4 = scmp.ne.s32.totalorder %s4182_s18, %s4178_s17 }
   0xa   : > { %s4293_s26 = scalar_select %p29_p1, %s4186_s19, %s31_s24  }
   0xb   : > { %p40_p5 = por %p39_p2, %p38_p0  ;;  %p4295_p6 = por %p278_p3, %p38_p0 }
   0xc   : > { %p284_p7 = scmp.eq.s32.totalorder %s3157_s22, 1  ;;  %p3159_p9 = scmp.ge.s32.totalorder %s4190_s20, 2 }
   0xe   : > { %p4299_p8 = por %p284_p7, %p283_p4  ;;  %330 = sbr.rel (%p3159_p9) target bundleno = 33 (0x21), region = 56 }
  0x15   : > { %333 = sbr.rel (!%p40_p5) target bundleno = 33 (0x21), region = 60  ;;  %s335_s29 = sand.u32 (%p40_p5), 1, %s4186_s19  }
  0x16   : > { %s3277_s30 = sshll.u32 (%p40_p5), %s4190_s20, 4  ;;  %s3160_s12 = sshll.u32 (%p40_p5), %s335_s29, 5 }
  0x17   : > { %s4770_s0 = sld [smem:[#allocation6_spill]] (%p40_p5)  ;;  %s337_s16 = scalar_lea.vmem (%p40_p5), [#allocation2], %s3160_s12 }
  0x1d   : > { %s340_s15 = scalar_lea.vmem %s4770_s0, %s3277_s30 }
  0x1e   : > { %v353_v0 = vld [vmem:[%s340_s15] sm:$0xff]  ;;  %v355_v1 = vld [vmem:[%s340_s15 + $0x8] sm:$0xff] }
  0x1f   : > { %v357_v2 = vld [vmem:[%s340_s15 + $0x20] sm:$0xff]  ;;  %354 = vst [vmem:[%s337_s16] sm:$0xff] %v353_v0  ;;  %356 = vst [vmem:[%s337_s16 + $0x8] sm:$0xff] %v355_v1  ;;  %v359_v3 = vld [vmem:[%s340_s15 + $0x28] sm:$0xff] }
  0x20   : > { %358 = vst [vmem:[%s337_s16 + $0x10] sm:$0xff] %v357_v2  ;;  %360 = vst [vmem:[%s337_s16 + $0x18] sm:$0xff] %v359_v3 }
  0x21 PF: > { %p3163_p10 = scmp.ge.s32.totalorder %s4190_s20, 1  ;;  %p365_p11 = scmp.lt.s32.totalorder %s4190_s20, 3 }
  0x23   : > { %p366_p12 = pnand %p3163_p10, %p365_p11 }
  0x24   : > { %s4314_s22 = sand.u32 (!%p366_p12), 1, %s4182_s18   ;;  %v413_v4 = vld [vmem:[%s4755_s1] sm:$0xff] (!%p366_p12)  ;;  %vm536_vm0 = vcmask (!%p366_p12), 130048   ;;  %v4192_v6 = vmov (!%p366_p12), 0   ;;  %v432_v7 = vld [vmem:[%s4756_s2 + $0x10] sm:$0xff] (!%p366_p12)  ;;  %v431_v14 = vld [vmem:[%s4756_s2 + $0x8] sm:$0xff] (!%p366_p12) }
  0x25   : > { %369 = sbr.rel (%p366_p12) target bundleno = 3233 (0xca1), region = 83  ;;  %s3164_s29 = sshll.u32 (!%p366_p12), %s4314_s22, 5  ;;  %3497 = vmatprep.mubr.msk.f32.mxu0 (!%p366_p12), %vm536_vm0, %v413_v4  ;;  %3507 = vmatprep.mubr.msk.f32.mxu1 (!%p366_p12), %vm536_vm0, %v413_v4  ;;  %v430_v5 = vld [vmem:[%s4756_s2] sm:$0xff] (!%p366_p12)  ;;  %v433_v15 = vld [vmem:[%s4756_s2 + $0x18] sm:$0xff] (!%p366_p12)  ;;  %v414_v16 = vld [vmem:[%s4755_s1 + $0x8] sm:$0xff] (!%p366_p12)  ;;  %vm727_vm1 = vcmask (!%p366_p12), 261120  }
  0x26   : > { %4126 = vset.pattern.permute.xlu0 (!%p366_p12), %v4192_v6  ;;  %4127 = vset.pattern.permute.xlu1 (!%p366_p12), %v4192_v6  ;;  %s374_s15 = scalar_lea.vmem (!%p366_p12), [#allocation2], %s3164_s29  ;;  %v415_v17 = vld [vmem:[%s4755_s1 + $0x10] sm:$0xff] (!%p366_p12)  ;;  %v454_v18 = vld [vmem:[%s4758_s4] sm:$0xff] (!%p366_p12)  ;;  %v455_v19 = vld [vmem:[%s4758_s4 + $0x8] sm:$0xff] (!%p366_p12)  ;;  %vm4194_vm2 = vmmov (!%p366_p12), 0   ;;  %s3165_s29 = sshll.u32 (!%p366_p12), %s4314_s22, 4 }
  0x27   : > { %v532_v8 = vld [vmem:[%s374_s15] sm:$0xff] (!%p366_p12)  ;;  %v533_v9 = vld [vmem:[%s374_s15 + $0x10] sm:$0xff] (!%p366_p12)  ;;  %v534_v10 = vld [vmem:[%s374_s15 + $0x8] sm:$0xff] (!%p366_p12)  ;;  %436 = vperm.xlu0 (!%p366_p12), %4126, %v430_v5   ;;  %446 = vperm.xlu1 (!%p366_p12), %4127, %v432_v7   ;;  %s4771_s12 = sadd.s32 (!%p366_p12), 4294967295, %s4190_s20   ;;  %s410_s14 = scalar_lea.vmem (!%p366_p12), [#allocation3], %s3165_s29 }
  0x28   : > { %v3871_v11 = vpack.c.bf16 (!%p366_p12), %v533_v9, %v532_v8  ;;  %v535_v12 = vld [vmem:[%s374_s15 + $0x18] sm:$0xff] (!%p366_p12)  ;;  %v456_v21 = vld [vmem:[%s4758_s4 + $0x10] sm:$0xff] (!%p366_p12)  ;;  %v478_v23 = vld [vmem:[%s4760_s6] sm:$0xff] (!%p366_p12)  ;;  %s3278_s13 = sshll.u32 (!%p366_p12), %s4771_s12, 8  ;;  %s3092_s21 = sshll.u32 (!%p366_p12), %s410_s14, 4  ;;  %s4712_s21 = int_to_ptr.vmem [resolvable:$true] %s3092_s21 }
  0x29   : > { %v3875_v13 = vpack.c.bf16 (!%p366_p12), %v535_v12, %v534_v10  ;;  %v416_v20 = vld [vmem:[%s4755_s1 + $0x18] sm:$0xff] (!%p366_p12)  ;;  %v479_v24 = vld [vmem:[%s4760_s6 + $0x8] sm:$0xff] (!%p366_p12)  ;;  %v480_v25 = vld [vmem:[%s4760_s6 + $0x10] sm:$0xff] (!%p366_p12)  ;;  %s4710_s24 = scalar_lea.hbm (!%p366_p12), %s4765_s11, %s3278_s13  ;;  %s3078_s25 = scalar_lea.sflag (!%p366_p12), [#allocation4], %s4314_s22 }
  0x2a   : > { %3872 = vmatprep.subr.bf16.mxu0 (!%p366_p12), %v3871_v11  ;;  %v457_v22 = vld [vmem:[%s4758_s4 + $0x18] sm:$0xff] (!%p366_p12)  ;;  %v502_v27 = vld [vmem:[%s4762_s8] sm:$0xff] (!%p366_p12)  ;;  %v503_v28 = vld [vmem:[%s4762_s8 + $0x8] sm:$0xff] (!%p366_p12)  ;;  %s4128_s30 = scalar_lea.vmem (!%p366_p12), %s4712_s21, 256  ;;  %s4196_s29 = smov (!%p366_p12), [#allocation3]  }
  0x2b   : > { %3876 = vmatprep.subr.bf16.mxu1 (!%p366_p12), %v3875_v13  ;;  %3874 = vmatpush3.bf16.msra.mxu0 (!%p366_p12), %v3871_v11  ;;  %v481_v26 = vld [vmem:[%s4760_s6 + $0x18] sm:$0xff] (!%p366_p12)  ;;  %v504_v29 = vld [vmem:[%s4762_s8 + $0x10] sm:$0xff] (!%p366_p12)  ;;  %v526_v31 = vld [vmem:[%s4764_s10] sm:$0xff] (!%p366_p12)  ;;  %p4129_p13 = scmp.ne.s32.totalorder (!%p366_p12), %s4712_s21, %s4128_s30  ;;  %s4132_s12 = sshll.u32 (!%p366_p12), %s4196_s29, 4  ;;  %s4133_s12 = int_to_ptr.vmem [resolvable:$false] %s4132_s12 }
  0x2c   : > { %3878 = vmatpush3.bf16.msra.mxu1 %v3875_v13  ;;  %441 = vperm.xlu0 %4126, %v431_v14   ;;  %v505_v30 = vld [vmem:[%s4762_s8 + $0x18] sm:$0xff]  ;;  %v417_v32 = vld [vmem:[%s4757_s3] sm:$0xff]  ;;  %v418_v1 = vld [vmem:[%s4757_s3 + $0x8] sm:$0xff]  ;;  %s4134_s0 = scalar_lea.vmem %s4133_s12, 512  ;;  %p4135_p2 = scmp.lt.s32.totalorder %s4712_s21, %s4133_s12 }
  0x2d   : > { %451 = vperm.xlu1 %4127, %v433_v15   ;;  %v419_v2 = vld [vmem:[%s4757_s3 + $0x10] sm:$0xff]  ;;  %v420_v3 = vld [vmem:[%s4757_s3 + $0x18] sm:$0xff]  ;;  %v421_v4 = vld [vmem:[%s4759_s5] sm:$0xff]  ;;  %p4130_p0 = pnand %p4129_p13, %p4295_p6  ;;  %p4136_p3 = scmp.lt.s32.totalorder %s4134_s0, %s4128_s30 }
  0x2e   : > { %3498 = vmatmul.mubr.msk.f32.vlgmr.msra.gmra.mrb[0].mxu0 %vm536_vm0, %v414_v16 }
  0x2f   : > { %3508 = vmatmul.mubr.msk.f32.vlgmr.msra.gmra.mrb[0].mxu1 %vm536_vm0, %v414_v16  ;;  %3500 = vmatprep.mubr.msk.f32.mxu0 %vm536_vm0, %v415_v17  ;;  %p4131_p1 = pneg %p4130_p0  ;;  %p4137_p4 = por %p4136_p3, %p4135_p2 }
  0x30   : > { %3510 = vmatprep.mubr.msk.f32.mxu1 %vm536_vm0, %v415_v17  ;;  %460 = vperm.xlu0 %4126, %v454_v18  }
  0x31   : > { %465 = vperm.xlu1 %4127, %v455_v19   ;;  %p4138_p5 = pnand %p4137_p4, %p4131_p1 }
  0x32   : > { %3501 = vmatmul.mubr.msk.f32.gmra.mrb[2].mxu0 %vm536_vm0, %v416_v20 }
  0x33   : > { %3511 = vmatmul.mubr.msk.f32.gmra.mrb[2].mxu1 %vm536_vm0, %v416_v20  ;;  %3521 = vmatprep.mubr.msk.f32.mxu0 %vm727_vm1, %v417_v32 }
  0x34   : > { %470 = vperm.xlu0 %4126, %v456_v21   ;;  %3535 = vmatprep.mubr.msk.f32.mxu1 %vm727_vm1, %v417_v32 }
  0x35   : > { %475 = vperm.xlu1 %4127, %v457_v22  }
  0x38   : > { %484 = vperm.xlu0 %4126, %v478_v23  }
  0x39   : > { %489 = vperm.xlu1 %4127, %v479_v24  }
  0x3c   : > { %494 = vperm.xlu0 %4126, %v480_v25  }
  0x3d   : > { %499 = vperm.xlu1 %4127, %v481_v26  }
  0x40   : > { %508 = vperm.xlu0 %4126, %v502_v27  }
  0x41   : > { %513 = vperm.xlu1 %4127, %v503_v28  }
  0x44   : > { %518 = vperm.xlu0 %4126, %v504_v29  }
  0x45   : > { %523 = vperm.xlu1 %4127, %v505_v30  }
  0x48   : > { %529 = vperm.xlu0 %4126, %v526_v31  }
  0xa6   : > { %v437_v33 = vpop.permute.xlu0 %436  ;;  %v447_v34 = vpop.permute.xlu1 %446 }
  0xab   : > { %v442_v35 = vpop.permute.xlu0 %441 }
  0xac   : > { %v452_v45 = vpop.permute.xlu1 %451 }
  0xaf   : > { %v461_v5 = vpop.permute.xlu0 %460 }
  0xb0   : > { %v466_v6 = vpop.permute.xlu1 %465 }
  0xb3   : > { %v471_v14 = vpop.permute.xlu0 %470 }
  0xb4   : > { %v476_v17 = vpop.permute.xlu1 %475 }
 0x101   : > { %v3499_v36 = vpop.f32.mrb[0].mxu0 }
 0x102   : > { %v621_v37 = vadd.f32 %v3499_v36, %v442_v35  ;;  %v3509_v38 = vpop.f32.mrb[0].mxu1  ;;  %v615_v39 = vpop.f32.mrb[1].mxu0 }
 0x103   : > { %v710_v40 = vadd.f32 %v3509_v38, %v442_v35  ;;  %v616_v41 = vadd.f32 %v615_v39, %v437_v33  ;;  %v704_v42 = vpop.f32.mrb[1].mxu1  ;;  %v423_v38 = vld [vmem:[%s4759_s5 + $0x10] sm:$0xff]  ;;  %v424_v39 = vld [vmem:[%s4759_s5 + $0x18] sm:$0xff] }
 0x104   : > { %v635_v43 = vmax.f32 %v621_v37, 0.0  ;;  %v705_v44 = vadd.f32 %v704_v42, %v437_v33  ;;  %v422_v37 = vld [vmem:[%s4759_s5 + $0x8] sm:$0xff]  ;;  %v490_v42 = vpop.permute.xlu1 %489 }
 0x105   : > { %v724_v46 = vmax.f32 %v710_v40, 0.0  ;;  %v634_v47 = vmax.f32 %v616_v41, 0.0  ;;  %v3502_v48 = vpop.f32.mrb[2].mxu0  ;;  %v4434_v40 = vld [vmem:[%s4761_s7] sm:$0xff]  ;;  %v485_v41 = vpop.permute.xlu0 %484 }
 0x106   : > { %v723_v49 = vmax.f32 %v705_v44, 0.0  ;;  %v631_v50 = vadd.f32 %v3502_v48, %v452_v45  ;;  %v3512_v51 = vpop.f32.mrb[2].mxu1  ;;  %v625_v52 = vpop.f32.mrb[3].mxu0 }
 0x107   : > { %v3879_v53 = vpack.c.bf16 %v635_v43, %v634_v47  ;;  %v720_v54 = vadd.f32 %v3512_v51, %v452_v45  ;;  %v626_v55 = vadd.f32 %v625_v52, %v447_v34  ;;  %v714_v56 = vpop.f32.mrb[3].mxu1 }
 0x108   : > { %v3887_v57 = vpack.c.bf16 %v724_v46, %v723_v49  ;;  %v637_v58 = vmax.f32 %v631_v50, 0.0  ;;  %v715_v59 = vadd.f32 %v714_v56, %v447_v34 }
 0x109   : > { %v726_v60 = vmax.f32 %v720_v54, 0.0  ;;  %v636_v61 = vmax.f32 %v626_v55, 0.0  ;;  %3880 = vmatprep.subr.bf16.mxu0 %v3879_v53  ;;  %v495_v50 = vpop.permute.xlu0 %494 }
 0x10a   : > { %v725_v62 = vmax.f32 %v715_v59, 0.0  ;;  %3888 = vmatprep.subr.bf16.mxu1 %v3887_v57  ;;  %3882 = vmatpush3.bf16.msra.mxu0 %v3879_v53  ;;  %v500_v53 = vpop.permute.xlu1 %499 }
 0x10b   : > { %v3883_v63 = vpack.c.bf16 %v637_v58, %v636_v61  ;;  %3890 = vmatpush3.bf16.msra.mxu1 %v3887_v57 }
 0x10c   : > { %v3891_v0 = vpack.c.bf16 %v726_v60, %v725_v62 }
 0x10d   : > { %3884 = vmatprep.subr.bf16.mxu0 %v3883_v63 }
 0x10e   : > { %3892 = vmatprep.subr.bf16.mxu1 %v3891_v0  ;;  %3886 = vmatpush3.bf16.msra.mxu0 %v3883_v63 }
 0x10f   : > { %3894 = vmatpush3.bf16.msra.mxu1 %v3891_v0 }
 0x111   : > { %3522 = vmatmul.mubr.msk.f32.vlgmr.msra.gmra.mrb[4].mxu0 %vm727_vm1, %v418_v1 }
 0x112   : > { %3536 = vmatmul.mubr.msk.f32.vlgmr.msra.gmra.mrb[4].mxu1 %vm727_vm1, %v418_v1  ;;  %3524 = vmatprep.mubr.msk.f32.mxu0 %vm727_vm1, %v419_v2 }
 0x113   : > { %3538 = vmatprep.mubr.msk.f32.mxu1 %vm727_vm1, %v419_v2 }
 0x115   : > { %3525 = vmatmul.mubr.msk.f32.gmra.mrb[6].mxu0 %vm727_vm1, %v420_v3 }
 0x116   : > { %3539 = vmatmul.mubr.msk.f32.gmra.mrb[6].mxu1 %vm727_vm1, %v420_v3  ;;  %3549 = vmatprep.mubr.msk.f32.mxu0 %vm727_vm1, %v421_v4 }
 0x117   : > { %3563 = vmatprep.mubr.msk.f32.mxu1 %vm727_vm1, %v421_v4 }
 0x1e4   : > { %v3523_v7 = vpop.f32.mrb[4].mxu0 }
 0x1e5   : > { %v812_v8 = vadd.f32 %v3523_v7, %v466_v6  ;;  %v3537_v9 = vpop.f32.mrb[4].mxu1  ;;  %v806_v10 = vpop.f32.mrb[5].mxu0 }
 0x1e6   : > { %v901_v11 = vadd.f32 %v3537_v9, %v466_v6  ;;  %v807_v12 = vadd.f32 %v806_v10, %v461_v5  ;;  %v895_v13 = vpop.f32.mrb[5].mxu1 }
 0x1e7   : > { %v826_v15 = vmax.f32 %v812_v8, 0.0  ;;  %v896_v16 = vadd.f32 %v895_v13, %v461_v5 }
 0x1e8   : > { %v915_v18 = vmax.f32 %v901_v11, 0.0  ;;  %v825_v19 = vmax.f32 %v807_v12, 0.0  ;;  %v3526_v20 = vpop.f32.mrb[6].mxu0 }
 0x1e9   : > { %v914_v21 = vmax.f32 %v896_v16, 0.0  ;;  %v4413_v22 = vadd.f32 %v3526_v20, %v476_v17  ;;  %v3540_v23 = vpop.f32.mrb[6].mxu1  ;;  %v816_v24 = vpop.f32.mrb[7].mxu0 }
 0x1ea   : > { %v3895_v25 = vpack.c.bf16 %v826_v15, %v825_v19  ;;  %v911_v26 = vadd.f32 %v3540_v23, %v476_v17  ;;  %v817_v27 = vadd.f32 %v816_v24, %v471_v14  ;;  %v905_v28 = vpop.f32.mrb[7].mxu1  ;;  %v4443_v17 = vld [vmem:[%s4761_s7 + $0x8] sm:$0xff]  ;;  %v4471_v20 = vpop.permute.xlu0 %508 }
 0x1eb   : > { %v3903_v29 = vpack.c.bf16 %v915_v18, %v914_v21  ;;  %v828_v30 = vmax.f32 %v4413_v22, 0.0  ;;  %v906_v31 = vadd.f32 %v905_v28, %v471_v14 }
 0x1ec   : > { %v917_v32 = vmax.f32 %v911_v26, 0.0  ;;  %v827_v33 = vmax.f32 %v817_v27, 0.0  ;;  %3896 = vmatprep.subr.bf16.mxu0 %v3895_v25 }
 0x1ed   : > { %v916_v34 = vmax.f32 %v906_v31, 0.0  ;;  %3904 = vmatprep.subr.bf16.mxu1 %v3903_v29  ;;  %3898 = vmatpush3.bf16.msra.mxu0 %v3895_v25 }
 0x1ee   : > { %v3899_v35 = vpack.c.bf16 %v828_v30, %v827_v33  ;;  %3906 = vmatpush3.bf16.msra.mxu1 %v3903_v29  ;;  %v4478_v29 = vpop.permute.xlu0 %518 }
 0x1ef   : > { %v3907_v36 = vpack.c.bf16 %v917_v32, %v916_v34 }
 0x1f0   : > { %3900 = vmatprep.subr.bf16.mxu0 %v3899_v35 }
 0x1f1   : > { %3908 = vmatprep.subr.bf16.mxu1 %v3907_v36  ;;  %3902 = vmatpush3.bf16.msra.mxu0 %v3899_v35 }
 0x1f2   : > { %3910 = vmatpush3.bf16.msra.mxu1 %v3907_v36 }
 0x1f4   : > { %3550 = vmatmul.mubr.msk.f32.vlgmr.msra.gmra.mrb[8].mxu0 %vm727_vm1, %v422_v37 }
 0x1f5   : > { %3564 = vmatmul.mubr.msk.f32.vlgmr.msra.gmra.mrb[8].mxu1 %vm727_vm1, %v422_v37  ;;  %3552 = vmatprep.mubr.msk.f32.mxu0 %vm727_vm1, %v423_v38 }
 0x1f6   : > { %3566 = vmatprep.mubr.msk.f32.mxu1 %vm727_vm1, %v423_v38 }
 0x1f8   : > { %3553 = vmatmul.mubr.msk.f32.gmra.mrb[10].mxu0 %vm727_vm1, %v424_v39 }
 0x1f9   : > { %3567 = vmatmul.mubr.msk.f32.gmra.mrb[10].mxu1 %vm727_vm1, %v424_v39  ;;  %3577 = vmatprep.mubr.msk.f32.mxu0 %vm727_vm1, %v4434_v40 }
 0x1fa   : > { %3591 = vmatprep.mubr.msk.f32.mxu1 %vm727_vm1, %v4434_v40 }
 0x2c7   : > { %v3551_v43 = vpop.f32.mrb[8].mxu0 }
 0x2c8   : > { %v1002_v44 = vadd.f32 %v3551_v43, %v490_v42  ;;  %v3565_v45 = vpop.f32.mrb[8].mxu1  ;;  %v996_v46 = vpop.f32.mrb[9].mxu0 }
 0x2c9   : > { %v1095_v47 = vadd.f32 %v3565_v45, %v490_v42  ;;  %v997_v48 = vadd.f32 %v996_v46, %v485_v41  ;;  %v1089_v49 = vpop.f32.mrb[9].mxu1 }
 0x2ca   : > { %v1016_v51 = vadd.f32 %v1002_v44, %v826_v15  ;;  %v1090_v52 = vadd.f32 %v1089_v49, %v485_v41 }
 0x2cb   : > { %v1109_v54 = vadd.f32 %v1095_v47, %v915_v18  ;;  %v1015_v55 = vadd.f32 %v997_v48, %v825_v19  ;;  %v3554_v56 = vpop.f32.mrb[10].mxu0  ;;  %v4448_v18 = vld [vmem:[%s4761_s7 + $0x10] sm:$0xff]  ;;  %v4459_v19 = vld [vmem:[%s4761_s7 + $0x18] sm:$0xff] }
 0x2cc   : > { %v1020_v57 = vmax.f32 %v1016_v51, 0.0  ;;  %v1108_v58 = vadd.f32 %v1090_v52, %v914_v21  ;;  %v1012_v59 = vadd.f32 %v3554_v56, %v500_v53  ;;  %v3568_v60 = vpop.f32.mrb[10].mxu1  ;;  %v1006_v61 = vpop.f32.mrb[11].mxu0 }
 0x2cd   : > { %v1113_v62 = vmax.f32 %v1109_v54, 0.0  ;;  %v1019_v63 = vmax.f32 %v1015_v55, 0.0  ;;  %v1105_v0 = vadd.f32 %v3568_v60, %v500_v53  ;;  %v1007_v1 = vadd.f32 %v1006_v61, %v495_v50  ;;  %v1099_v2 = vpop.f32.mrb[11].mxu1  ;;  %v4473_v21 = vpop.permute.xlu1 %513 }
 0x2ce   : > { %v1112_v3 = vmax.f32 %v1108_v58, 0.0  ;;  %v1018_v4 = vadd.f32 %v1012_v59, %v828_v30  ;;  %v1100_v5 = vadd.f32 %v1099_v2, %v495_v50 }
 0x2cf   : > { %v1111_v6 = vadd.f32 %v1105_v0, %v917_v32  ;;  %v1017_v7 = vadd.f32 %v1007_v1, %v827_v33  ;;  %v3911_v8 = vpack.c.bf16 %v1020_v57, %v1019_v63 }
 0x2d0   : > { %v1022_v9 = vmax.f32 %v1018_v4, 0.0  ;;  %v1110_v10 = vadd.f32 %v1100_v5, %v916_v34  ;;  %v3919_v11 = vpack.c.bf16 %v1113_v62, %v1112_v3 }
 0x2d1   : > { %v1115_v12 = vmax.f32 %v1111_v6, 0.0  ;;  %v1021_v13 = vmax.f32 %v1017_v7, 0.0  ;;  %3912 = vmatprep.subr.bf16.mxu0 %v3911_v8  ;;  %v4481_v32 = vpop.permute.xlu1 %523 }
 0x2d2   : > { %v1114_v14 = vmax.f32 %v1110_v10, 0.0  ;;  %3920 = vmatprep.subr.bf16.mxu1 %v3919_v11  ;;  %3914 = vmatpush3.bf16.msra.mxu0 %v3911_v8 }
 0x2d3   : > { %3922 = vmatpush3.bf16.msra.mxu1 %v3919_v11  ;;  %v3915_v15 = vpack.c.bf16 %v1022_v9, %v1021_v13 }
 0x2d4   : > { %v3923_v16 = vpack.c.bf16 %v1115_v12, %v1114_v14 }
 0x2d5   : > { %3916 = vmatprep.subr.bf16.mxu0 %v3915_v15 }
 0x2d6   : > { %3924 = vmatprep.subr.bf16.mxu1 %v3923_v16  ;;  %3918 = vmatpush3.bf16.msra.mxu0 %v3915_v15 }
 0x2d7   : > { %3926 = vmatpush3.bf16.msra.mxu1 %v3923_v16 }
 0x2d9   : > { %3578 = vmatmul.mubr.msk.f32.vlgmr.msra.gmra.mrb[12].mxu0 %vm727_vm1, %v4443_v17 }
 0x2da   : > { %3592 = vmatmul.mubr.msk.f32.vlgmr.msra.gmra.mrb[12].mxu1 %vm727_vm1, %v4443_v17  ;;  %3580 = vmatprep.mubr.msk.f32.mxu0 %vm727_vm1, %v4448_v18 }
 0x2db   : > { %3594 = vmatprep.mubr.msk.f32.mxu1 %vm727_vm1, %v4448_v18 }
 0x2dd   : > { %3581 = vmatmul.mubr.msk.f32.gmra.mrb[14].mxu0 %vm727_vm1, %v4459_v19 }
 0x2de   : > { %3595 = vmatmul.mubr.msk.f32.gmra.mrb[14].mxu1 %vm727_vm1, %v4459_v19  ;;  %3605 = vmatprep.mubr.msk.f32.mxu0 %vm727_vm1, %v4434_v40 }
 0x2df   : > { %3619 = vmatprep.mubr.msk.f32.mxu1 %vm727_vm1, %v4434_v40 }
 0x3ac   : > { %v3579_v22 = vpop.f32.mrb[12].mxu0 }
 0x3ad   : > { %v1200_v23 = vadd.f32 %v3579_v22, %v4473_v21  ;;  %v3593_v24 = vpop.f32.mrb[12].mxu1  ;;  %v1194_v25 = vpop.f32.mrb[13].mxu0 }
 0x3ae   : > { %v1289_v26 = vadd.f32 %v3593_v24, %v4473_v21  ;;  %v1195_v27 = vadd.f32 %v1194_v25, %v4471_v20  ;;  %v1283_v28 = vpop.f32.mrb[13].mxu1 }
 0x3af   : > { %v1214_v30 = vmax.f32 %v1200_v23, 0.0  ;;  %v1284_v31 = vadd.f32 %v1283_v28, %v4471_v20 }
 0x3b0   : > { %v1303_v33 = vmax.f32 %v1289_v26, 0.0  ;;  %v1213_v34 = vmax.f32 %v1195_v27, 0.0  ;;  %v3582_v35 = vpop.f32.mrb[14].mxu0 }
 0x3b1   : > { %v1302_v36 = vmax.f32 %v1284_v31, 0.0  ;;  %v1210_v37 = vadd.f32 %v3582_v35, %v4481_v32  ;;  %v3596_v38 = vpop.f32.mrb[14].mxu1  ;;  %v1204_v39 = vpop.f32.mrb[15].mxu0 }
 0x3b2   : > { %v3927_v41 = vpack.c.bf16 %v1214_v30, %v1213_v34  ;;  %v1299_v42 = vadd.f32 %v3596_v38, %v4481_v32  ;;  %v1205_v43 = vadd.f32 %v1204_v39, %v4478_v29  ;;  %v1293_v44 = vpop.f32.mrb[15].mxu1 }
 0x3b3   : > { %v3935_v45 = vpack.c.bf16 %v1303_v33, %v1302_v36  ;;  %v1216_v46 = vmax.f32 %v1210_v37, 0.0  ;;  %v1294_v47 = vadd.f32 %v1293_v44, %v4478_v29 }
 0x3b4   : > { %v1305_v48 = vmax.f32 %v1299_v42, 0.0  ;;  %v1215_v49 = vmax.f32 %v1205_v43, 0.0  ;;  %3928 = vmatprep.subr.bf16.mxu0 %v3927_v41 }
 0x3b5   : > { %v1304_v50 = vmax.f32 %v1294_v47, 0.0  ;;  %3936 = vmatprep.subr.bf16.mxu1 %v3935_v45  ;;  %3930 = vmatpush3.bf16.msra.mxu0 %v3927_v41 }
 0x3b6   : > { %v3931_v51 = vpack.c.bf16 %v1216_v46, %v1215_v49  ;;  %3938 = vmatpush3.bf16.msra.mxu1 %v3935_v45 }
 0x3b7   : > { %v3939_v52 = vpack.c.bf16 %v1305_v48, %v1304_v50 }
 0x3b8   : > { %3932 = vmatprep.subr.bf16.mxu0 %v3931_v51 }
 0x3b9   : > { %3940 = vmatprep.subr.bf16.mxu1 %v3939_v52  ;;  %3934 = vmatpush3.bf16.msra.mxu0 %v3931_v51 }
 0x3ba   : > { %3942 = vmatpush3.bf16.msra.mxu1 %v3939_v52 }
 0x3bc   : > { %3606 = vmatmul.mubr.msk.f32.vlgmr.msra.gmra.mrb[16].mxu0 %vm727_vm1, %v4443_v17 }
 0x3bd   : > { %3620 = vmatmul.mubr.msk.f32.vlgmr.msra.gmra.mrb[16].mxu1 %vm727_vm1, %v4443_v17  ;;  %3608 = vmatprep.mubr.msk.f32.mxu0 %vm727_vm1, %v4448_v18 }
 0x3be   : > { %3622 = vmatprep.mubr.msk.f32.mxu1 %vm727_vm1, %v4448_v18 }
 0x3c0   : > { %3609 = vmatmul.mubr.msk.f32.gmra.mrb[18].mxu0 %vm727_vm1, %v4459_v19 }
 0x3c1   : > { %3623 = vmatmul.mubr.msk.f32.gmra.mrb[18].mxu1 %vm727_vm1, %v4459_v19  ;;  %3633 = vmatprep.mubr.msk.f32.mxu0 %vm727_vm1, %v4434_v40 }
 0x3c2   : > { %3647 = vmatprep.mubr.msk.f32.mxu1 %vm727_vm1, %v4434_v40 }
 0x48f   : > { %v3607_v53 = vpop.f32.mrb[16].mxu0 }
 0x490   : > { %v1378_v54 = vadd.f32 %v3607_v53, %v4473_v21  ;;  %v3621_v55 = vpop.f32.mrb[16].mxu1  ;;  %v1372_v56 = vpop.f32.mrb[17].mxu0 }
 0x491   : > { %v1467_v57 = vadd.f32 %v3621_v55, %v4473_v21  ;;  %v1373_v58 = vadd.f32 %v1372_v56, %v4471_v20  ;;  %v1461_v59 = vpop.f32.mrb[17].mxu1 }
 0x492   : > { %v1392_v60 = vmax.f32 %v1378_v54, 0.0  ;;  %v1462_v61 = vadd.f32 %v1461_v59, %v4471_v20 }
 0x493   : > { %v1481_v62 = vmax.f32 %v1467_v57, 0.0  ;;  %v1391_v63 = vmax.f32 %v1373_v58, 0.0  ;;  %v3610_v0 = vpop.f32.mrb[18].mxu0 }
 0x494   : > { %v1480_v1 = vmax.f32 %v1462_v61, 0.0  ;;  %v1388_v2 = vadd.f32 %v3610_v0, %v4481_v32  ;;  %v3624_v3 = vpop.f32.mrb[18].mxu1  ;;  %v1382_v4 = vpop.f32.mrb[19].mxu0 }
 0x495   : > { %v3943_v5 = vpack.c.bf16 %v1392_v60, %v1391_v63  ;;  %v1477_v6 = vadd.f32 %v3624_v3, %v4481_v32  ;;  %v1383_v7 = vadd.f32 %v1382_v4, %v4478_v29  ;;  %v1471_v8 = vpop.f32.mrb[19].mxu1 }
 0x496   : > { %v3951_v9 = vpack.c.bf16 %v1481_v62, %v1480_v1  ;;  %v1394_v10 = vmax.f32 %v1388_v2, 0.0  ;;  %v1472_v11 = vadd.f32 %v1471_v8, %v4478_v29 }
 0x497   : > { %v1483_v12 = vmax.f32 %v1477_v6, 0.0  ;;  %v1393_v13 = vmax.f32 %v1383_v7, 0.0  ;;  %3944 = vmatprep.subr.bf16.mxu0 %v3943_v5 }
 0x498   : > { %v1482_v14 = vmax.f32 %v1472_v11, 0.0  ;;  %3952 = vmatprep.subr.bf16.mxu1 %v3951_v9  ;;  %3946 = vmatpush3.bf16.msra.mxu0 %v3943_v5 }
 0x499   : > { %v3947_v15 = vpack.c.bf16 %v1394_v10, %v1393_v13  ;;  %3954 = vmatpush3.bf16.msra.mxu1 %v3951_v9 }
 0x49a   : > { %v3955_v16 = vpack.c.bf16 %v1483_v12, %v1482_v14 }
 0x49b   : > { %3948 = vmatprep.subr.bf16.mxu0 %v3947_v15 }
 0x49c   : > { %3956 = vmatprep.subr.bf16.mxu1 %v3955_v16  ;;  %3950 = vmatpush3.bf16.msra.mxu0 %v3947_v15 }
 0x49d   : > { %3958 = vmatpush3.bf16.msra.mxu1 %v3955_v16 }
 0x49f   : > { %3634 = vmatmul.mubr.msk.f32.vlgmr.msra.gmra.mrb[20].mxu0 %vm727_vm1, %v4443_v17 }
 0x4a0   : > { %3648 = vmatmul.mubr.msk.f32.vlgmr.msra.gmra.mrb[20].mxu1 %vm727_vm1, %v4443_v17  ;;  %3636 = vmatprep.mubr.msk.f32.mxu0 %vm727_vm1, %v4448_v18 }
 0x4a1   : > { %3650 = vmatprep.mubr.msk.f32.mxu1 %vm727_vm1, %v4448_v18 }
 0x4a3   : > { %3637 = vmatmul.mubr.msk.f32.gmra.mrb[22].mxu0 %vm727_vm1, %v4459_v19 }
 0x4a4   : > { %3651 = vmatmul.mubr.msk.f32.gmra.mrb[22].mxu1 %vm727_vm1, %v4459_v19  ;;  %3661 = vmatprep.mubr.msk.f32.mxu0 %vm727_vm1, %v4434_v40 }
 0x4a5   : > { %3675 = vmatprep.mubr.msk.f32.mxu1 %vm727_vm1, %v4434_v40 }
 0x572   : > { %v3635_v22 = vpop.f32.mrb[20].mxu0 }
 0x573   : > { %v1556_v23 = vadd.f32 %v3635_v22, %v4473_v21  ;;  %v3649_v24 = vpop.f32.mrb[20].mxu1  ;;  %v1550_v25 = vpop.f32.mrb[21].mxu0 }
 0x574   : > { %v1649_v26 = vadd.f32 %v3649_v24, %v4473_v21  ;;  %v1551_v27 = vadd.f32 %v1550_v25, %v4471_v20  ;;  %v1643_v28 = vpop.f32.mrb[21].mxu1 }
 0x575   : > { %v1570_v30 = vadd.f32 %v1556_v23, %v1392_v60  ;;  %v1644_v31 = vadd.f32 %v1643_v28, %v4471_v20 }
 0x576   : > { %v1663_v33 = vadd.f32 %v1649_v26, %v1481_v62  ;;  %v1569_v34 = vadd.f32 %v1551_v27, %v1391_v63  ;;  %v3638_v35 = vpop.f32.mrb[22].mxu0 }
 0x577   : > { %v1574_v36 = vmax.f32 %v1570_v30, 0.0  ;;  %v1662_v37 = vadd.f32 %v1644_v31, %v1480_v1  ;;  %v1566_v38 = vadd.f32 %v3638_v35, %v4481_v32  ;;  %v3652_v39 = vpop.f32.mrb[22].mxu1  ;;  %v1560_v41 = vpop.f32.mrb[23].mxu0 }
 0x578   : > { %v1667_v42 = vmax.f32 %v1663_v33, 0.0  ;;  %v1573_v43 = vmax.f32 %v1569_v34, 0.0  ;;  %v1659_v44 = vadd.f32 %v3652_v39, %v4481_v32  ;;  %v1561_v45 = vadd.f32 %v1560_v41, %v4478_v29  ;;  %v1653_v46 = vpop.f32.mrb[23].mxu1 }
 0x579   : > { %v1666_v47 = vmax.f32 %v1662_v37, 0.0  ;;  %v1572_v48 = vadd.f32 %v1566_v38, %v1394_v10  ;;  %v1654_v49 = vadd.f32 %v1653_v46, %v4478_v29 }
 0x57a   : > { %v1665_v50 = vadd.f32 %v1659_v44, %v1483_v12  ;;  %v1571_v51 = vadd.f32 %v1561_v45, %v1393_v13  ;;  %v3959_v52 = vpack.c.bf16 %v1574_v36, %v1573_v43 }
 0x57b   : > { %v1576_v53 = vmax.f32 %v1572_v48, 0.0  ;;  %v1664_v54 = vadd.f32 %v1654_v49, %v1482_v14  ;;  %v3967_v55 = vpack.c.bf16 %v1667_v42, %v1666_v47 }
 0x57c   : > { %v1669_v56 = vmax.f32 %v1665_v50, 0.0  ;;  %v1575_v57 = vmax.f32 %v1571_v51, 0.0  ;;  %3960 = vmatprep.subr.bf16.mxu0 %v3959_v52 }
 0x57d   : > { %v1668_v58 = vmax.f32 %v1664_v54, 0.0  ;;  %3968 = vmatprep.subr.bf16.mxu1 %v3967_v55  ;;  %3962 = vmatpush3.bf16.msra.mxu0 %v3959_v52 }
 0x57e   : > { %3970 = vmatpush3.bf16.msra.mxu1 %v3967_v55  ;;  %v3963_v59 = vpack.c.bf16 %v1576_v53, %v1575_v57 }
 0x57f   : > { %v3971_v60 = vpack.c.bf16 %v1669_v56, %v1668_v58 }
 0x580   : > { %3964 = vmatprep.subr.bf16.mxu0 %v3963_v59 }
 0x581   : > { %3972 = vmatprep.subr.bf16.mxu1 %v3971_v60  ;;  %3966 = vmatpush3.bf16.msra.mxu0 %v3963_v59 }
 0x582   : > { %3974 = vmatpush3.bf16.msra.mxu1 %v3971_v60 }
 0x584   : > { %3662 = vmatmul.mubr.msk.f32.vlgmr.msra.gmra.mrb[24].mxu0 %vm727_vm1, %v4443_v17 }
 0x585   : > { %3676 = vmatmul.mubr.msk.f32.vlgmr.msra.gmra.mrb[24].mxu1 %vm727_vm1, %v4443_v17  ;;  %3664 = vmatprep.mubr.msk.f32.mxu0 %vm727_vm1, %v4448_v18 }
 0x586   : > { %3678 = vmatprep.mubr.msk.f32.mxu1 %vm727_vm1, %v4448_v18 }
 0x588   : > { %3665 = vmatmul.mubr.msk.f32.gmra.mrb[26].mxu0 %vm727_vm1, %v4459_v19 }
 0x589   : > { %3679 = vmatmul.mubr.msk.f32.gmra.mrb[26].mxu1 %vm727_vm1, %v4459_v19  ;;  %3689 = vmatprep.mubr.msk.f32.mxu0 %vm727_vm1, %v4434_v40 }
 0x58a   : > { %3703 = vmatprep.mubr.msk.f32.mxu1 %vm727_vm1, %v4434_v40 }
 0x657   : > { %v3663_v61 = vpop.f32.mrb[24].mxu0 }
 0x658   : > { %v1742_v62 = vadd.f32 %v3663_v61, %v4473_v21  ;;  %v3677_v63 = vpop.f32.mrb[24].mxu1  ;;  %v1736_v0 = vpop.f32.mrb[25].mxu0 }
 0x659   : > { %v1831_v1 = vadd.f32 %v3677_v63, %v4473_v21  ;;  %v1737_v2 = vadd.f32 %v1736_v0, %v4471_v20  ;;  %v1825_v3 = vpop.f32.mrb[25].mxu1 }
 0x65a   : > { %v1756_v4 = vmax.f32 %v1742_v62, 0.0  ;;  %v1826_v5 = vadd.f32 %v1825_v3, %v4471_v20 }
 0x65b   : > { %v1845_v6 = vmax.f32 %v1831_v1, 0.0  ;;  %v1755_v7 = vmax.f32 %v1737_v2, 0.0  ;;  %v3666_v8 = vpop.f32.mrb[26].mxu0 }
 0x65c   : > { %v1844_v9 = vmax.f32 %v1826_v5, 0.0  ;;  %v1752_v10 = vadd.f32 %v3666_v8, %v4481_v32  ;;  %v3680_v11 = vpop.f32.mrb[26].mxu1  ;;  %v1746_v12 = vpop.f32.mrb[27].mxu0 }
 0x65d   : > { %v3975_v13 = vpack.c.bf16 %v1756_v4, %v1755_v7  ;;  %v1841_v14 = vadd.f32 %v3680_v11, %v4481_v32  ;;  %v1747_v15 = vadd.f32 %v1746_v12, %v4478_v29  ;;  %v1835_v16 = vpop.f32.mrb[27].mxu1 }
 0x65e   : > { %v3983_v22 = vpack.c.bf16 %v1845_v6, %v1844_v9  ;;  %v1758_v23 = vmax.f32 %v1752_v10, 0.0  ;;  %v1836_v24 = vadd.f32 %v1835_v16, %v4478_v29 }
 0x65f   : > { %v1847_v25 = vmax.f32 %v1841_v14, 0.0  ;;  %v1757_v26 = vmax.f32 %v1747_v15, 0.0  ;;  %3976 = vmatprep.subr.bf16.mxu0 %v3975_v13 }
 0x660   : > { %v1846_v27 = vmax.f32 %v1836_v24, 0.0  ;;  %3984 = vmatprep.subr.bf16.mxu1 %v3983_v22  ;;  %3978 = vmatpush3.bf16.msra.mxu0 %v3975_v13 }
 0x661   : > { %v3979_v28 = vpack.c.bf16 %v1758_v23, %v1757_v26  ;;  %3986 = vmatpush3.bf16.msra.mxu1 %v3983_v22 }
 0x662   : > { %v3987_v30 = vpack.c.bf16 %v1847_v25, %v1846_v27 }
 0x663   : > { %3980 = vmatprep.subr.bf16.mxu0 %v3979_v28 }
 0x664   : > { %3988 = vmatprep.subr.bf16.mxu1 %v3987_v30  ;;  %3982 = vmatpush3.bf16.msra.mxu0 %v3979_v28 }
 0x665   : > { %3990 = vmatpush3.bf16.msra.mxu1 %v3987_v30 }
 0x667   : > { %3690 = vmatmul.mubr.msk.f32.vlgmr.msra.gmra.mrb[28].mxu0 %vm727_vm1, %v4443_v17 }
 0x668   : > { %3704 = vmatmul.mubr.msk.f32.vlgmr.msra.gmra.mrb[28].mxu1 %vm727_vm1, %v4443_v17  ;;  %3692 = vmatprep.mubr.msk.f32.mxu0 %vm727_vm1, %v4448_v18 }
 0x669   : > { %3706 = vmatprep.mubr.msk.f32.mxu1 %vm727_vm1, %v4448_v18 }
 0x66b   : > { %3693 = vmatmul.mubr.msk.f32.gmra.mrb[30].mxu0 %vm727_vm1, %v4459_v19 }
 0x66c   : > { %3707 = vmatmul.mubr.msk.f32.gmra.mrb[30].mxu1 %vm727_vm1, %v4459_v19  ;;  %3717 = vmatprep.mubr.msk.f32.mxu0 %vm727_vm1, %v4434_v40 }
 0x66d   : > { %3731 = vmatprep.mubr.msk.f32.mxu1 %vm727_vm1, %v4434_v40 }
 0x73a   : > { %v3691_v31 = vpop.f32.mrb[28].mxu0 }
 0x73b   : > { %v1920_v33 = vadd.f32 %v3691_v31, %v4473_v21  ;;  %v3705_v34 = vpop.f32.mrb[28].mxu1  ;;  %v1914_v35 = vpop.f32.mrb[29].mxu0 }
 0x73c   : > { %v2009_v36 = vadd.f32 %v3705_v34, %v4473_v21  ;;  %v1915_v37 = vadd.f32 %v1914_v35, %v4471_v20  ;;  %v2003_v38 = vpop.f32.mrb[29].mxu1 }
 0x73d   : > { %v1934_v39 = vmax.f32 %v1920_v33, 0.0  ;;  %v2004_v41 = vadd.f32 %v2003_v38, %v4471_v20 }
 0x73e   : > { %v2023_v42 = vmax.f32 %v2009_v36, 0.0  ;;  %v1933_v43 = vmax.f32 %v1915_v37, 0.0  ;;  %v3694_v44 = vpop.f32.mrb[30].mxu0 }
 0x73f   : > { %v2022_v45 = vmax.f32 %v2004_v41, 0.0  ;;  %v1930_v46 = vadd.f32 %v3694_v44, %v4481_v32  ;;  %v3708_v47 = vpop.f32.mrb[30].mxu1  ;;  %v1924_v48 = vpop.f32.mrb[31].mxu0 }
 0x740   : > { %v3991_v49 = vpack.c.bf16 %v1934_v39, %v1933_v43  ;;  %v2019_v50 = vadd.f32 %v3708_v47, %v4481_v32  ;;  %v1925_v51 = vadd.f32 %v1924_v48, %v4478_v29  ;;  %v2013_v52 = vpop.f32.mrb[31].mxu1 }
 0x741   : > { %v3999_v53 = vpack.c.bf16 %v2023_v42, %v2022_v45  ;;  %v1936_v54 = vmax.f32 %v1930_v46, 0.0  ;;  %v2014_v55 = vadd.f32 %v2013_v52, %v4478_v29 }
 0x742   : > { %v2025_v56 = vmax.f32 %v2019_v50, 0.0  ;;  %v1935_v57 = vmax.f32 %v1925_v51, 0.0  ;;  %3992 = vmatprep.subr.bf16.mxu0 %v3991_v49 }
 0x743   : > { %v2024_v58 = vmax.f32 %v2014_v55, 0.0  ;;  %4000 = vmatprep.subr.bf16.mxu1 %v3999_v53  ;;  %3994 = vmatpush3.bf16.msra.mxu0 %v3991_v49 }
 0x744   : > { %v3995_v59 = vpack.c.bf16 %v1936_v54, %v1935_v57  ;;  %4002 = vmatpush3.bf16.msra.mxu1 %v3999_v53 }
 0x745   : > { %v4003_v60 = vpack.c.bf16 %v2025_v56, %v2024_v58 }
 0x746   : > { %3996 = vmatprep.subr.bf16.mxu0 %v3995_v59 }
 0x747   : > { %4004 = vmatprep.subr.bf16.mxu1 %v4003_v60  ;;  %3998 = vmatpush3.bf16.msra.mxu0 %v3995_v59 }
 0x748   : > { %4006 = vmatpush3.bf16.msra.mxu1 %v4003_v60 }
 0x74a   : > { %3718 = vmatmul.mubr.msk.f32.vlgmr.msra.gmra.mrb[32].mxu0 %vm727_vm1, %v4443_v17 }
 0x74b   : > { %3732 = vmatmul.mubr.msk.f32.vlgmr.msra.gmra.mrb[32].mxu1 %vm727_vm1, %v4443_v17  ;;  %3720 = vmatprep.mubr.msk.f32.mxu0 %vm727_vm1, %v4448_v18 }
 0x74c   : > { %3734 = vmatprep.mubr.msk.f32.mxu1 %vm727_vm1, %v4448_v18 }
 0x74e   : > { %3721 = vmatmul.mubr.msk.f32.gmra.mrb[34].mxu0 %vm727_vm1, %v4459_v19 }
 0x74f   : > { %3735 = vmatmul.mubr.msk.f32.gmra.mrb[34].mxu1 %vm727_vm1, %v4459_v19  ;;  %3745 = vmatprep.mubr.msk.f32.mxu0 %vm727_vm1, %v4434_v40 }
 0x750   : > { %3759 = vmatprep.mubr.msk.f32.mxu1 %vm727_vm1, %v4434_v40 }
 0x81d   : > { %v3719_v61 = vpop.f32.mrb[32].mxu0 }
 0x81e   : > { %v2098_v62 = vadd.f32 %v3719_v61, %v4473_v21  ;;  %v3733_v63 = vpop.f32.mrb[32].mxu1  ;;  %v2092_v0 = vpop.f32.mrb[33].mxu0 }
 0x81f   : > { %v2191_v1 = vadd.f32 %v3733_v63, %v4473_v21  ;;  %v2093_v2 = vadd.f32 %v2092_v0, %v4471_v20  ;;  %v2185_v3 = vpop.f32.mrb[33].mxu1 }
 0x820   : > { %v2112_v4 = vadd.f32 %v2098_v62, %v1934_v39  ;;  %v2186_v5 = vadd.f32 %v2185_v3, %v4471_v20 }
 0x821   : > { %v2205_v6 = vadd.f32 %v2191_v1, %v2023_v42  ;;  %v2111_v7 = vadd.f32 %v2093_v2, %v1933_v43  ;;  %v3722_v8 = vpop.f32.mrb[34].mxu0 }
 0x822   : > { %v2116_v9 = vmax.f32 %v2112_v4, 0.0  ;;  %v2204_v10 = vadd.f32 %v2186_v5, %v2022_v45  ;;  %v2108_v11 = vadd.f32 %v3722_v8, %v4481_v32  ;;  %v3736_v12 = vpop.f32.mrb[34].mxu1  ;;  %v2102_v13 = vpop.f32.mrb[35].mxu0 }
 0x823   : > { %v2209_v14 = vmax.f32 %v2205_v6, 0.0  ;;  %v2115_v15 = vmax.f32 %v2111_v7, 0.0  ;;  %v2201_v16 = vadd.f32 %v3736_v12, %v4481_v32  ;;  %v2103_v22 = vadd.f32 %v2102_v13, %v4478_v29  ;;  %v2195_v23 = vpop.f32.mrb[35].mxu1 }
 0x824   : > { %v2208_v24 = vmax.f32 %v2204_v10, 0.0  ;;  %v2114_v25 = vadd.f32 %v2108_v11, %v1936_v54  ;;  %v2196_v26 = vadd.f32 %v2195_v23, %v4478_v29 }
 0x825   : > { %v2207_v27 = vadd.f32 %v2201_v16, %v2025_v56  ;;  %v2113_v28 = vadd.f32 %v2103_v22, %v1935_v57  ;;  %v4007_v30 = vpack.c.bf16 %v2116_v9, %v2115_v15 }
 0x826   : > { %v2118_v31 = vmax.f32 %v2114_v25, 0.0  ;;  %v2206_v33 = vadd.f32 %v2196_v26, %v2024_v58  ;;  %v4015_v34 = vpack.c.bf16 %v2209_v14, %v2208_v24 }
 0x827   : > { %v2211_v35 = vmax.f32 %v2207_v27, 0.0  ;;  %v2117_v36 = vmax.f32 %v2113_v28, 0.0  ;;  %4008 = vmatprep.subr.bf16.mxu0 %v4007_v30 }
 0x828   : > { %v2210_v37 = vmax.f32 %v2206_v33, 0.0  ;;  %4016 = vmatprep.subr.bf16.mxu1 %v4015_v34  ;;  %4010 = vmatpush3.bf16.msra.mxu0 %v4007_v30 }
 0x829   : > { %4018 = vmatpush3.bf16.msra.mxu1 %v4015_v34  ;;  %v4011_v38 = vpack.c.bf16 %v2118_v31, %v2117_v36 }
 0x82a   : > { %v4019_v39 = vpack.c.bf16 %v2211_v35, %v2210_v37 }
 0x82b   : > { %4012 = vmatprep.subr.bf16.mxu0 %v4011_v38 }
 0x82c   : > { %4020 = vmatprep.subr.bf16.mxu1 %v4019_v39  ;;  %4014 = vmatpush3.bf16.msra.mxu0 %v4011_v38 }
 0x82d   : > { %4022 = vmatpush3.bf16.msra.mxu1 %v4019_v39 }
 0x82f   : > { %3746 = vmatmul.mubr.msk.f32.vlgmr.msra.gmra.mrb[36].mxu0 %vm727_vm1, %v4443_v17 }
 0x830   : > { %3760 = vmatmul.mubr.msk.f32.vlgmr.msra.gmra.mrb[36].mxu1 %vm727_vm1, %v4443_v17  ;;  %3748 = vmatprep.mubr.msk.f32.mxu0 %vm727_vm1, %v4448_v18 }
 0x831   : > { %3762 = vmatprep.mubr.msk.f32.mxu1 %vm727_vm1, %v4448_v18 }
 0x833   : > { %3749 = vmatmul.mubr.msk.f32.gmra.mrb[38].mxu0 %vm727_vm1, %v4459_v19 }
 0x834   : > { %3763 = vmatmul.mubr.msk.f32.gmra.mrb[38].mxu1 %vm727_vm1, %v4459_v19  ;;  %3773 = vmatprep.mubr.msk.f32.mxu0 %vm727_vm1, %v4434_v40 }
 0x835   : > { %3787 = vmatprep.mubr.msk.f32.mxu1 %vm727_vm1, %v4434_v40 }
 0x902   : > { %v3747_v41 = vpop.f32.mrb[36].mxu0 }
 0x903   : > { %v2284_v42 = vadd.f32 %v3747_v41, %v4473_v21  ;;  %v3761_v43 = vpop.f32.mrb[36].mxu1  ;;  %v2278_v44 = vpop.f32.mrb[37].mxu0 }
 0x904   : > { %v2373_v45 = vadd.f32 %v3761_v43, %v4473_v21  ;;  %v2279_v46 = vadd.f32 %v2278_v44, %v4471_v20  ;;  %v2367_v47 = vpop.f32.mrb[37].mxu1 }
 0x905   : > { %v2298_v48 = vmax.f32 %v2284_v42, 0.0  ;;  %v2368_v49 = vadd.f32 %v2367_v47, %v4471_v20 }
 0x906   : > { %v2387_v50 = vmax.f32 %v2373_v45, 0.0  ;;  %v2297_v51 = vmax.f32 %v2279_v46, 0.0  ;;  %v3750_v52 = vpop.f32.mrb[38].mxu0 }
 0x907   : > { %v2386_v53 = vmax.f32 %v2368_v49, 0.0  ;;  %v2294_v54 = vadd.f32 %v3750_v52, %v4481_v32  ;;  %v3764_v55 = vpop.f32.mrb[38].mxu1  ;;  %v2288_v56 = vpop.f32.mrb[39].mxu0 }
 0x908   : > { %v4023_v57 = vpack.c.bf16 %v2298_v48, %v2297_v51  ;;  %v2383_v58 = vadd.f32 %v3764_v55, %v4481_v32  ;;  %v2289_v59 = vadd.f32 %v2288_v56, %v4478_v29  ;;  %v2377_v60 = vpop.f32.mrb[39].mxu1 }
 0x909   : > { %v4031_v61 = vpack.c.bf16 %v2387_v50, %v2386_v53  ;;  %v2300_v62 = vmax.f32 %v2294_v54, 0.0  ;;  %v2378_v63 = vadd.f32 %v2377_v60, %v4478_v29 }
 0x90a   : > { %v2389_v0 = vmax.f32 %v2383_v58, 0.0  ;;  %v2299_v1 = vmax.f32 %v2289_v59, 0.0  ;;  %4024 = vmatprep.subr.bf16.mxu0 %v4023_v57 }
 0x90b   : > { %v2388_v2 = vmax.f32 %v2378_v63, 0.0  ;;  %4032 = vmatprep.subr.bf16.mxu1 %v4031_v61  ;;  %4026 = vmatpush3.bf16.msra.mxu0 %v4023_v57 }
 0x90c   : > { %v4027_v3 = vpack.c.bf16 %v2300_v62, %v2299_v1  ;;  %4034 = vmatpush3.bf16.msra.mxu1 %v4031_v61 }
 0x90d   : > { %v4035_v4 = vpack.c.bf16 %v2389_v0, %v2388_v2 }
 0x90e   : > { %4028 = vmatprep.subr.bf16.mxu0 %v4027_v3 }
 0x90f   : > { %4036 = vmatprep.subr.bf16.mxu1 %v4035_v4  ;;  %4030 = vmatpush3.bf16.msra.mxu0 %v4027_v3 }
 0x910   : > { %4038 = vmatpush3.bf16.msra.mxu1 %v4035_v4  ;;  %v4193_v4 = vmov 0.0|0.0  }
 0x912   : > { %3774 = vmatmul.mubr.msk.f32.vlgmr.msra.gmra.mrb[40].mxu0 %vm727_vm1, %v4443_v17 }
 0x913   : > { %3788 = vmatmul.mubr.msk.f32.vlgmr.msra.gmra.mrb[40].mxu1 %vm727_vm1, %v4443_v17  ;;  %3776 = vmatprep.mubr.msk.f32.mxu0 %vm727_vm1, %v4448_v18 }
 0x914   : > { %3790 = vmatprep.mubr.msk.f32.mxu1 %vm727_vm1, %v4448_v18 }
 0x916   : > { %3777 = vmatmul.mubr.msk.f32.gmra.mrb[42].mxu0 %vm727_vm1, %v4459_v19 }
 0x917   : > { %3791 = vmatmul.mubr.msk.f32.gmra.mrb[42].mxu1 %vm727_vm1, %v4459_v19  ;;  %3801 = vmatprep.mubr.msk.f32.mxu0 %vm727_vm1, %v4434_v40 }
 0x918   : > { %3815 = vmatprep.mubr.msk.f32.mxu1 %vm727_vm1, %v4434_v40 }
 0x9e5   : > { %v3775_v5 = vpop.f32.mrb[40].mxu0 }
 0x9e6   : > { %v2462_v6 = vadd.f32 %v3775_v5, %v4473_v21  ;;  %v3789_v7 = vpop.f32.mrb[40].mxu1  ;;  %v2456_v8 = vpop.f32.mrb[41].mxu0  ;;  %v4195_v5 = vmov 0.0  }
 0x9e7   : > { %v2551_v9 = vadd.f32 %v3789_v7, %v4473_v21  ;;  %v2457_v10 = vadd.f32 %v2456_v8, %v4471_v20  ;;  %v2545_v11 = vpop.f32.mrb[41].mxu1 }
 0x9e8   : > { %v2476_v12 = vmax.f32 %v2462_v6, 0.0  ;;  %v2546_v13 = vadd.f32 %v2545_v11, %v4471_v20 }
 0x9e9   : > { %v2565_v14 = vmax.f32 %v2551_v9, 0.0  ;;  %v2475_v15 = vmax.f32 %v2457_v10, 0.0  ;;  %v3778_v16 = vpop.f32.mrb[42].mxu0 }
 0x9ea   : > { %v2564_v22 = vmax.f32 %v2546_v13, 0.0  ;;  %v2472_v23 = vadd.f32 %v3778_v16, %v4481_v32  ;;  %v3792_v24 = vpop.f32.mrb[42].mxu1  ;;  %v2466_v25 = vpop.f32.mrb[43].mxu0 }
 0x9eb   : > { %v4039_v26 = vpack.c.bf16 %v2476_v12, %v2475_v15  ;;  %v2561_v27 = vadd.f32 %v3792_v24, %v4481_v32  ;;  %v2467_v28 = vadd.f32 %v2466_v25, %v4478_v29  ;;  %v2555_v30 = vpop.f32.mrb[43].mxu1 }
 0x9ec   : > { %v4047_v31 = vpack.c.bf16 %v2565_v14, %v2564_v22  ;;  %v2478_v33 = vmax.f32 %v2472_v23, 0.0  ;;  %v2556_v34 = vadd.f32 %v2555_v30, %v4478_v29 }
 0x9ed   : > { %v2567_v35 = vmax.f32 %v2561_v27, 0.0  ;;  %v2477_v36 = vmax.f32 %v2467_v28, 0.0  ;;  %4040 = vmatprep.subr.bf16.mxu0 %v4039_v26 }
 0x9ee   : > { %v2566_v37 = vmax.f32 %v2556_v34, 0.0  ;;  %4048 = vmatprep.subr.bf16.mxu1 %v4047_v31  ;;  %4042 = vmatpush3.bf16.msra.mxu0 %v4039_v26 }
 0x9ef   : > { %v4043_v38 = vpack.c.bf16 %v2478_v33, %v2477_v36  ;;  %4050 = vmatpush3.bf16.msra.mxu1 %v4047_v31 }
 0x9f0   : > { %v4051_v39 = vpack.c.bf16 %v2567_v35, %v2566_v37 }
 0x9f1   : > { %4044 = vmatprep.subr.bf16.mxu0 %v4043_v38 }
 0x9f2   : > { %4052 = vmatprep.subr.bf16.mxu1 %v4051_v39  ;;  %4046 = vmatpush3.bf16.msra.mxu0 %v4043_v38 }
 0x9f3   : > { %4054 = vmatpush3.bf16.msra.mxu1 %v4051_v39 }
 0x9f5   : > { %3802 = vmatmul.mubr.msk.f32.vlgmr.msra.gmra.mrb[44].mxu0 %vm727_vm1, %v4443_v17 }
 0x9f6   : > { %3816 = vmatmul.mubr.msk.f32.vlgmr.msra.gmra.mrb[44].mxu1 %vm727_vm1, %v4443_v17  ;;  %3804 = vmatprep.mubr.msk.f32.mxu0 %vm727_vm1, %v4448_v18 }
 0x9f7   : > { %3818 = vmatprep.mubr.msk.f32.mxu1 %vm727_vm1, %v4448_v18 }
 0x9f9   : > { %3805 = vmatmul.mubr.msk.f32.gmra.mrb[46].mxu0 %vm727_vm1, %v4459_v19 }
 0x9fa   : > { %3819 = vmatmul.mubr.msk.f32.gmra.mrb[46].mxu1 %vm727_vm1, %v4459_v19  ;;  %3829 = vmatprep.mubr.msk.f32.mxu0 %vm727_vm1, %v4434_v40 }
 0x9fb   : > { %3843 = vmatprep.mubr.msk.f32.mxu1 %vm727_vm1, %v4434_v40 }
 0xac8   : > { %v3803_v41 = vpop.f32.mrb[44].mxu0 }
 0xac9   : > { %v2640_v42 = vadd.f32 %v3803_v41, %v4473_v21  ;;  %v3817_v43 = vpop.f32.mrb[44].mxu1  ;;  %v2634_v44 = vpop.f32.mrb[45].mxu0 }
 0xaca   : > { %v2729_v45 = vadd.f32 %v3817_v43, %v4473_v21  ;;  %v2635_v46 = vadd.f32 %v2634_v44, %v4471_v20  ;;  %v2723_v47 = vpop.f32.mrb[45].mxu1  ;;  %v530_v44 = vpop.permute.xlu0 %529 }
 0xacb   : > { %v2654_v48 = vmax.f32 %v2640_v42, 0.0  ;;  %v2724_v49 = vadd.f32 %v2723_v47, %v4471_v20 }
 0xacc   : > { %v2743_v50 = vmax.f32 %v2729_v45, 0.0  ;;  %v2653_v51 = vmax.f32 %v2635_v46, 0.0  ;;  %v3806_v52 = vpop.f32.mrb[46].mxu0 }
 0xacd   : > { %v2742_v53 = vmax.f32 %v2724_v49, 0.0  ;;  %v2650_v54 = vadd.f32 %v3806_v52, %v4481_v32  ;;  %v3820_v40 = vpop.f32.mrb[46].mxu1  ;;  %v2644_v55 = vpop.f32.mrb[47].mxu0 }
 0xace   : > { %v4055_v56 = vpack.c.bf16 %v2654_v48, %v2653_v51  ;;  %v2739_v57 = vadd.f32 %v3820_v40, %v4481_v32  ;;  %v2645_v58 = vadd.f32 %v2644_v55, %v4478_v29  ;;  %v2733_v59 = vpop.f32.mrb[47].mxu1 }
 0xacf   : > { %v4063_v60 = vpack.c.bf16 %v2743_v50, %v2742_v53  ;;  %v2656_v61 = vmax.f32 %v2650_v54, 0.0  ;;  %v2734_v62 = vadd.f32 %v2733_v59, %v4478_v29 }
 0xad0   : > { %v2745_v63 = vmax.f32 %v2739_v57, 0.0  ;;  %v2655_v0 = vmax.f32 %v2645_v58, 0.0  ;;  %4056 = vmatprep.subr.bf16.mxu0 %v4055_v56 }
 0xad1   : > { %v2744_v1 = vmax.f32 %v2734_v62, 0.0  ;;  %4064 = vmatprep.subr.bf16.mxu1 %v4063_v60  ;;  %4058 = vmatpush3.bf16.msra.mxu0 %v4055_v56 }
 0xad2   : > { %v4059_v2 = vpack.c.bf16 %v2656_v61, %v2655_v0  ;;  %4066 = vmatpush3.bf16.msra.mxu1 %v4063_v60 }
 0xad3   : > { %v4067_v3 = vpack.c.bf16 %v2745_v63, %v2744_v1 }
 0xad4   : > { %4060 = vmatprep.subr.bf16.mxu0 %v4059_v2 }
 0xad5   : > { %4068 = vmatprep.subr.bf16.mxu1 %v4067_v3  ;;  %4062 = vmatpush3.bf16.msra.mxu0 %v4059_v2 }
 0xad6   : > { %4070 = vmatpush3.bf16.msra.mxu1 %v4067_v3  ;;  %4071 = vmatprep.subr.bf16.mxu0 %v4193_v4 }
 0xad7   : > { %4077 = vmatprep.subr.bf16.mxu1 %v4193_v4 }
 0xad8   : > { %3830 = vmatmul.mubr.msk.f32.vlgmr.msra.gmra.mrb[48].mxu0 %vm727_vm1, %v4443_v17 }
 0xad9   : > { %3844 = vmatmul.mubr.msk.f32.vlgmr.msra.gmra.mrb[48].mxu1 %vm727_vm1, %v4443_v17  ;;  %3832 = vmatprep.mubr.msk.f32.mxu0 %vm727_vm1, %v4448_v18 }
 0xada   : > { %3846 = vmatprep.mubr.msk.f32.mxu1 %vm727_vm1, %v4448_v18 }
 0xadc   : > { %3833 = vmatmul.mubr.msk.f32.gmra.mrb[50].mxu0 %vm727_vm1, %v4459_v19 }
 0xadd   : > { %3847 = vmatmul.mubr.msk.f32.gmra.mrb[50].mxu1 %vm727_vm1, %v4459_v19  ;;  %3857 = vmatprep.mubr.msk.f32.mxu0 %vm4194_vm2, %v4195_v5 }
 0xade   : > { %3868 = vmatprep.mubr.msk.f32.mxu1 %vm4194_vm2, %v4195_v5 }
 0xbab   : > { %v3831_v17 = vpop.f32.mrb[48].mxu0 }
 0xbac   : > { %v2818_v6 = vadd.f32 %v3831_v17, %v4473_v21  ;;  %v3845_v7 = vpop.f32.mrb[48].mxu1  ;;  %v2812_v8 = vpop.f32.mrb[49].mxu0 }
 0xbad   : > { %v2911_v18 = vadd.f32 %v3845_v7, %v4473_v21  ;;  %v2813_v9 = vadd.f32 %v2812_v8, %v4471_v20  ;;  %v2905_v10 = vpop.f32.mrb[49].mxu1 }
 0xbae   : > { %v2832_v11 = vadd.f32 %v2818_v6, %v2654_v48  ;;  %v2906_v19 = vadd.f32 %v2905_v10, %v4471_v20 }
 0xbaf   : > { %v2925_v12 = vadd.f32 %v2911_v18, %v2743_v50  ;;  %v2831_v13 = vadd.f32 %v2813_v9, %v2653_v51  ;;  %v3834_v14 = vpop.f32.mrb[50].mxu0 }
 0xbb0   : > { %v2836_v15 = vmax.f32 %v2832_v11, 0.0  ;;  %v2924_v16 = vadd.f32 %v2906_v19, %v2742_v53  ;;  %v2828_v22 = vadd.f32 %v3834_v14, %v4481_v32  ;;  %v3848_v23 = vpop.f32.mrb[50].mxu1  ;;  %v2822_v24 = vpop.f32.mrb[51].mxu0 }
 0xbb1   : > { %v2929_v25 = vmax.f32 %v2925_v12, 0.0  ;;  %v2835_v26 = vmax.f32 %v2831_v13, 0.0  ;;  %v2921_v27 = vadd.f32 %v3848_v23, %v4481_v32  ;;  %v2823_v21 = vadd.f32 %v2822_v24, %v4478_v29  ;;  %v2915_v28 = vpop.f32.mrb[51].mxu1 }
 0xbb2   : > { %v2928_v30 = vmax.f32 %v2924_v16, 0.0  ;;  %v2834_v31 = vadd.f32 %v2828_v22, %v2656_v61  ;;  %v2916_v20 = vadd.f32 %v2915_v28, %v4478_v29  ;;  %v429_v29 = vld [vmem:[%s4763_s9] sm:$0xff] }
 0xbb3   : > { %v4072_v33 = vpack.c.bf16 %v2836_v15, %v2835_v26  ;;  %v2927_v34 = vadd.f32 %v2921_v27, %v2745_v63  ;;  %v2833_v35 = vadd.f32 %v2823_v21, %v2655_v0 }
 0xbb4   : > { %v4078_v36 = vpack.c.bf16 %v2929_v25, %v2928_v30  ;;  %v2838_v37 = vmax.f32 %v2834_v31, 0.0  ;;  %v2926_v38 = vadd.f32 %v2916_v20, %v2744_v1 }
 0xbb5   : > { %v2931_v39 = vmax.f32 %v2927_v34, 0.0  ;;  %v2837_v41 = vmax.f32 %v2833_v35, 0.0  ;;  %4073 = vmatpush3.bf16.msra.mxu0 %v4072_v33 }
 0xbb6   : > { %v2930_v42 = vmax.f32 %v2926_v38, 0.0  ;;  %4079 = vmatpush3.bf16.msra.mxu1 %v4078_v36  ;;  %4074 = vmatprep.subr.bf16.mxu0 %v4193_v4 }
 0xbb7   : > { %v4075_v32 = vpack.c.bf16 %v2838_v37, %v2837_v41  ;;  %4080 = vmatprep.subr.bf16.mxu1 %v4193_v4 }
 0xbb8   : > { %v4081_v43 = vpack.c.bf16 %v2931_v39, %v2930_v42 }
 0xbb9   : > { %4076 = vmatpush3.bf16.msra.mxu0 %v4075_v32 }
 0xbba   : > { %4082 = vmatpush3.bf16.msra.mxu1 %v4081_v43 }
 0xbbc   : > { %3858 = vmatmul.mubr.msk.f32.vlgmr.msra.gmra.mrb[52].mxu0 %vm727_vm1, %v429_v29 }
 0xbbd   : > { %3869 = vmatmul.mubr.msk.f32.vlgmr.msra.gmra.mrb[52].mxu1 %vm727_vm1, %v429_v29 }
 0xc8f   : > { %v3001_v45 = vpop.f32.mrb[52].mxu0 }
 0xc90   : > { %v3002_v46 = vadd.f32 %v3001_v45, %v530_v44  ;;  %v3071_v47 = vpop.f32.mrb[52].mxu1  ;;  %v3859_v48 = vpop.f32.mrb[53].mxu0 }
 0xc91   : > { %v3072_v49 = vadd.f32 %v3071_v47, %v530_v44  ;;  %v3870_v50 = vpop.f32.mrb[53].mxu1 }
 0xc92   : > { %3075 = vst [vmem:[%s410_s14] sm:$0xff] %v3002_v46 }
 0xc93   : > { %3076 = vst [vmem:[%s410_s14 + $0x8] sm:$0xff] %v3072_v49 }
 0xc94   : > { %4141 = shalt.err (!%p4138_p5)
}
 0xc95   : > { %s4142_s22 = scalar_lea.hbm %s4710_s24, 256  ;;  %s4146_s15 = scalar_lea.hbm %s4765_s11, 512 }
 0xc96   : > { %p4143_p7 = scmp.ne.s32.totalorder %s4710_s24, %s4142_s22  ;;  %p4147_p12 = scmp.lt.u32.totalorder %s4710_s24, %s4765_s11 }
 0xc97   : > { %p4148_p13 = scmp.lt.u32.totalorder %s4146_s15, %s4142_s22  ;;  %p4150_p1 = scmp.lt.u32.totalorder %s4142_s22, %s4710_s24 }
 0xc98   : > { %p4144_p10 = pnand %p4143_p7, %p4295_p6 }
 0xc99   : > { %p4149_p0 = por %p4148_p13, %p4147_p12 }
 0xc9a   : > { %p4145_p11 = pneg %p4144_p10 }
 0xc9b   : > { %p4151_p2 = por %p4150_p1, %p4149_p0 }
 0xc9d   : > { %p4152_p3 = pnand %p4151_p2, %p4145_p11 }
 0xc9f   : > { %4155 = shalt.err (!%p4152_p3)
}
 0xca0   : > { %4083 = dma.vmem_to_hbm [thread:$0]  (%p4295_p6), %s4712_s21, 256, %s4710_s24, %s3078_s25  }
 0xca1 PF: > { %s3104_s0 = sand.u32 1, %s4178_s17   ;;  %p4086_p4 = pnand %p3159_p9, %p4299_p8 }
 0xca2   : > { %s3105_s30 = scalar_lea.sflag [#allocation4], %s3104_s0 }
 0xca3   : > { %4173 = dma.done.wait (!%p4086_p4), %s3105_s30, 256  }
 0xca4   : > { %4175 = vsyncadd (!%p4086_p4), %s3105_s30, 4294967040  ;;  %p21_p5 = scmp.ge.s32.totalorder %s4280_s23, 4   ;;  %s4772_s17 = smov %s4182_s18 }
 0xca5   : > { %s4773_s18 = smov %s4186_s19  ;;  %s4774_s19 = smov %s4293_s26 }
 0xca6   : > { %s4775_s20 = smov %s4280_s23  ;;  %23 = sbr.rel (!%p21_p5) target bundleno = 5 (0x5), region = 127 }
 0xcad   :  { %3110 = vsyncpa [#allocation4], 1 }
 0xcae   :  { %3112 = vsyncpa [#allocation4 + $0x1], 1 }

</bundles_post_ra>
